<compile_context>
chip_gen: v7x
topology: tpu7x:2x2x1
jax: 0.10.0
libtpu: 0.0.40
codegen_flags: <defaults>
</compile_context>

<pallas_src>
import functools

import jax
import jax.numpy as jnp
from jax import lax
from jax.experimental import pallas as pl
from jax.experimental.pallas import tpu as pltpu


# ---------------------------------------------------------------------------
# Pallas kernels: fused 3-branch rotated 3x3 conv, row-tiled, pipelined halo
# ---------------------------------------------------------------------------

def _rotconv_acc_kernel(x_main_ref, x_halo_ref, w_ref, o_ref, acc_ref):
    """Per-tap accumulate path (preferred when Cin >= 128): no im2col patch.

    x_main_ref : (1, TH, Wp, Cin)   main rows of the padded NHWC input (auto-pipelined)
    x_halo_ref : (1, 2,  Wp, Cin)   the 2 rows below the tile (auto-pipelined, tiny DMA)
    w_ref      : (1, 9*Cin, Ctot)   rotated taps; row = (kh*3+kw)*Cin + ci, col = branch*Cout+co
    o_ref      : (1, TH*W, Ctot)    flattened output pixels of this tile
    acc_ref    : (TH*W, Ctot) f32   accumulator scratch
    """
    TH = x_main_ref.shape[1]
    Cin = x_main_ref.shape[3]
    M = o_ref.shape[1]
    W = M // TH

    for kh in range(3):
        for kw in range(3):
            tap = (kh * 3 + kw) * Cin
            w_tap = w_ref[0, tap:tap + Cin, :]                                  # (Cin, Ctot)
            xm = x_main_ref[0, kh:TH, kw:kw + W, :].reshape((TH - kh) * W, Cin)
            ym = jnp.dot(xm, w_tap, preferred_element_type=jnp.float32)
            if kh == 0 and kw == 0:
                acc_ref[...] = ym                       # first tap initializes (no zero pass)
            else:
                acc_ref[0:(TH - kh) * W] += ym
            if kh > 0:                                   # last kh output rows use halo rows
                xh = x_halo_ref[0, 0:kh, kw:kw + W, :].reshape(kh * W, Cin)
                acc_ref[(TH - kh) * W:M] += jnp.dot(
                    xh, w_tap, preferred_element_type=jnp.float32)
    o_ref[0] = acc_ref[...].astype(o_ref.dtype)


def _rotconv_im2col_kernel(x_main_ref, x_halo_ref, w_ref, o_ref):
    """Deep-K single-matmul path (preferred when Cin is small): one K=9*Cin MXU matmul."""
    TH = x_main_ref.shape[1]
    Cin = x_main_ref.shape[3]
    M = o_ref.shape[1]
    W = M // TH

    xwin = jnp.concatenate([x_main_ref[0], x_halo_ref[0]], axis=0)      # (TH+2, Wp, Cin)
    cols = [xwin[kh:kh + TH, kw:kw + W, :] for kh in range(3) for kw in range(3)]
    patch = jnp.concatenate(cols, axis=-1).reshape(M, 9 * Cin)          # (TH*W, 9*Cin)
    acc = jnp.dot(patch, w_ref[0], preferred_element_type=jnp.float32)
    o_ref[0] = acc.astype(o_ref.dtype)


# ---------------------------------------------------------------------------
# VMEM accounting / generation-aware tiling
# ---------------------------------------------------------------------------

def _vmem_capacity_bytes():
    try:
        cap = getattr(pltpu.get_tpu_info(), "vmem_capacity_bytes", None)
        if cap:
            return int(cap)
    except Exception:
        pass
    return 64 << 20  # conservative fallback (v7x per-TensorCore VMEM)


def _conv_step_vmem_bytes(th, Wp, W, Cin, Ctot, in_bytes, out_bytes, use_im2col):
    """Per-grid-step VMEM working set (double-buffered pipelined blocks + scratch/values)."""
    x_blk = 2 * th * Wp * Cin * in_bytes           # main rows
    halo = 2 * 2 * Wp * Cin * in_bytes             # halo rows
    w_blk = 2 * 9 * Cin * Ctot * in_bytes          # rotated taps
    o_blk = 2 * th * W * Ctot * out_bytes          # output tile
    acc = th * W * Ctot * 4                        # f32 accumulator (scratch or value)
    extra = 0
    if use_im2col:
        extra = (th * W * 9 * Cin + (th + 2) * Wp * Cin) * in_bytes   # patch + window values
    return x_blk + halo + w_blk + o_blk + acc + extra


def _choose_row_tile(H, W, Wp, Cin, Ctot, in_bytes, out_bytes, use_im2col, budget_bytes):
    """Largest multiple-of-8 row tile whose working set stays under the budget."""
    h_cap = max(8, ((H + 7) // 8) * 8)
    th = 8
    while (th + 8 <= h_cap and
           _conv_step_vmem_bytes(th + 8, Wp, W, Cin, Ctot,
                                 in_bytes, out_bytes, use_im2col) <= budget_bytes):
        th += 8
    return th


def _fused_rotated_conv(x_pad, taps, *, row_tile, W, out_dtype, use_im2col):
    """x_pad: (bs, Hp+2, Wp, Cin) padded NHWC; taps: (bs, 9*Cin, Ctot).
    Returns (bs, Hp*W, Ctot) flattened output pixels."""
    bs, Hp2, Wp, Cin = x_pad.shape
    Hp = Hp2 - 2
    n_h = Hp // row_tile
    Ctot = taps.shape[-1]

    in_bytes = jnp.dtype(x_pad.dtype).itemsize
    out_bytes = jnp.dtype(out_dtype).itemsize
    est = _conv_step_vmem_bytes(row_tile, Wp, W, Cin, Ctot, in_bytes, out_bytes, use_im2col)
    cap = _vmem_capacity_bytes()
    vmem_limit = int(min(cap - cap // 8, max(est + (16 << 20), 32 << 20)))

    kernel = _rotconv_im2col_kernel if use_im2col else _rotconv_acc_kernel
    scratch = [] if use_im2col else [pltpu.VMEM((row_tile * W, Ctot), jnp.float32)]

    return pl.pallas_call(
        kernel,
        out_shape=jax.ShapeDtypeStruct((bs, Hp * W, Ctot), out_dtype),
        grid=(bs, n_h),
        in_specs=[
            # main rows of the tile
            pl.BlockSpec((1, row_tile, Wp, Cin), lambda b, h: (b, h, 0, 0)),
            # 2 halo rows just below the tile (block size 2 -> block index (h+1)*row_tile/2)
            pl.BlockSpec((1, 2, Wp, Cin),
                         lambda b, h: (b, (h + 1) * (row_tile // 2), 0, 0)),
            # per-sample rotated taps (constant across row tiles)
            pl.BlockSpec((1, 9 * Cin, Ctot), lambda b, h: (b, 0, 0)),
        ],
        out_specs=pl.BlockSpec((1, row_tile * W, Ctot), lambda b, h: (b, h, 0)),
        scratch_shapes=scratch,
        compiler_params=pltpu.CompilerParams(
            dimension_semantics=("parallel", "parallel"),
            vmem_limit_bytes=vmem_limit,
        ),
    )(x_pad, x_pad, taps)


# ---------------------------------------------------------------------------
# Rotation-matrix construction + weight mixing (tiny; plain JAX, XLA fuses it)
# ---------------------------------------------------------------------------

def _get_rotation_matrix(thetas):
    """thetas: (bs, g) -> rotation matrices (bs, g, 9, 9). Mirrors the torch code."""
    bs, g = thetas.shape
    t = thetas.reshape(-1)
    x = jnp.cos(t)
    y = jnp.sin(t)
    a = x - y
    b = x * y
    c = x + y
    z = jnp.zeros_like(t)
    o = jnp.ones_like(t)

    def rows(row_list):
        return jnp.stack([jnp.stack(r, axis=0) for r in row_list], axis=0)  # (9, 9, N)

    pos = rows([
        [a, 1 - a, z, z, z, z, z, z, z],
        [z, x - b, b, z, 1 - c + b, y - b, z, z, z],
        [z, z, a, z, z, 1 - a, z, z, z],
        [b, y - b, z, x - b, 1 - c + b, z, z, z, z],
        [z, z, z, z, o, z, z, z, z],
        [z, z, z, z, 1 - c + b, x - b, z, y - b, b],
        [z, z, z, 1 - a, z, z, a, z, z],
        [z, z, z, y - b, 1 - c + b, z, b, x - b, z],
        [z, z, z, z, z, z, z, 1 - a, a],
    ])
    neg = rows([
        [c, z, z, 1 - c, z, z, z, z, z],
        [-b, x + b, z, b - y, 1 - a - b, z, z, z, z],
        [z, 1 - c, c, z, z, z, z, z, z],
        [z, z, z, x + b, 1 - a - b, z, -b, b - y, z],
        [z, z, z, z, o, z, z, z, z],
        [z, b - y, -b, z, 1 - a - b, x + b, z, z, z],
        [z, z, z, z, z, z, c, 1 - c, z],
        [z, z, z, z, 1 - a - b, b - y, z, x + b, -b],
        [z, z, z, z, z, 1 - c, z, z, c],
    ])
    mask = (t >= 0).astype(thetas.dtype)[None, None, :]
    rot = mask * pos + (1.0 - mask) * neg            # (9, 9, bs*g)
    rot = jnp.transpose(rot, (2, 0, 1)).reshape(bs, g, 9, 9)
    return rot


def rotate_mix_weights(branch_weights, lambdas, thetas):
    """Batch `batch_rotate_multiweight` over all 3 branches with one small matmul.

    branch_weights: list of 3 arrays (n, Cout, Cin, 3, 3)
    lambdas/thetas: (b, n)
    Returns rotated taps (b, 9*Cin, 3*Cout); row = (kh*3+kw)*Cin + ci, col = branch*Cout + co.
    """
    b, n = thetas.shape
    _, Cout, Cin, _, _ = branch_weights[0].shape

    rot = _get_rotation_matrix(thetas) * lambdas[:, :, None, None]     # (b, n, 9, 9)
    rot = jnp.transpose(rot, (0, 2, 1, 3)).reshape(b * 9, n * 9)

    w = jnp.stack(branch_weights, axis=0)                  # (3, n, Cout, Cin, 3, 3)
    w = jnp.transpose(w, (1, 4, 5, 0, 2, 3))               # (n, kh, kw, branch, Cout, Cin)
    w = w.reshape(n * 9, 3 * Cout * Cin)

    mixed = jnp.dot(rot, w)                                # tiny: left to XLA
    mixed = mixed.reshape(b, 3, 3, 3, Cout, Cin)           # (b, kh, kw, branch, Cout, Cin)
    taps = jnp.transpose(mixed, (0, 1, 2, 5, 3, 4)).reshape(b, 9 * Cin, 3 * Cout)
    return taps


# ---------------------------------------------------------------------------
# Module: routing + fused rotated conv (3 branches concatenated on channels)
# ---------------------------------------------------------------------------

def routing_func(x_nchw, rp):
    pooled = jnp.mean(x_nchw, axis=(2, 3))                    # (bs, Cin)
    alphas = jax.nn.softmax(pooled @ rp["w_alpha"] + rp["b_alpha"], axis=-1)
    angles = (jax.nn.sigmoid(pooled @ rp["w_theta"] + rp["b_theta"]) - 0.5) * jnp.pi
    return alphas, angles


def multi_scale_rotated_conv2d(x, params, *, use_pallas=True, use_im2col=None,
                               compute_dtype=jnp.bfloat16, out_dtype=None,
                               row_tile=None):
    """x: (bs, Cin, H, W) NCHW -> (bs, 3*Cout, H, W)."""
    bs, Cin, H, W = x.shape
    if out_dtype is None:
        out_dtype = x.dtype        # set to bf16 on mem-bound v5e deployments if acceptable

    alphas, angles = routing_func(x, params["routing"])                   # shared head
    taps = rotate_mix_weights(params["branch_weights"], alphas, angles)   # (bs, 9*Cin, 3*Cout)
    Ctot = taps.shape[-1]

    # Layout plumbing done ONCE (not per branch): NCHW -> NHWC, bf16 compute dtype.
    x_nhwc = jnp.transpose(x, (0, 2, 3, 1)).astype(compute_dtype)
    taps = taps.astype(compute_dtype)

    if not use_pallas:
        # Plain-JAX reference: identical bf16 inputs / f32 accumulation, per-batch lax conv.
        x_pad = jnp.pad(x_nhwc, ((0, 0), (1, 1), (1, 1), (0, 0)))
        w_hwio = taps.reshape(bs, 3, 3, Cin, Ctot)
        outs = [
            lax.conv_general_dilated(
                x_pad[i:i + 1], w_hwio[i], window_strides=(1, 1), padding="VALID",
                dimension_numbers=("NHWC", "HWIO", "NHWC"),
                preferred_element_type=jnp.float32).astype(out_dtype)
            for i in range(bs)
        ]
        out_nhwc = jnp.concatenate(outs, axis=0)
        return jnp.transpose(out_nhwc, (0, 3, 1, 2))

    if use_im2col is None:
        use_im2col = Cin < 128       # deep-K single matmul only pays off for small Cin

    Wp = ((W + 2 + 7) // 8) * 8      # padded width rounded to a sublane multiple
    if row_tile is None:
        in_bytes = jnp.dtype(compute_dtype).itemsize
        out_bytes = jnp.dtype(out_dtype).itemsize
        cap = _vmem_capacity_bytes()
        budget = max(8 << 20, min(int(cap * 0.6), cap - cap // 8 - (16 << 20)))
        row_tile = _choose_row_tile(H, W, Wp, Cin, Ctot, in_bytes, out_bytes,
                                    use_im2col, budget)
    if row_tile % 8 != 0:
        raise ValueError("row_tile must be a multiple of 8")

    n_h = pl.cdiv(H, row_tile)
    Hp = n_h * row_tile
    # conv padding=1 (top/left) + bottom rows up to a row-tile multiple + 2 halo rows,
    # right columns up to Wp (>= W+2); the extra zero columns are never read by any tap.
    x_pad = jnp.pad(x_nhwc, ((0, 0), (1, Hp - H + 1), (1, Wp - W - 1), (0, 0)))
    out_flat = _fused_rotated_conv(x_pad, taps, row_tile=row_tile, W=W,
                                   out_dtype=out_dtype, use_im2col=use_im2col)
    out_nhwc = out_flat.reshape(bs, Hp, W, Ctot)[:, :H]
    return jnp.transpose(out_nhwc, (0, 3, 1, 2))              # (bs, 3*Cout, H, W)


def init_params(key, in_channels, out_channels, kernel_number):
    keys = jax.random.split(key, 5)
    # kaiming_normal fan_out for 5D (kn, Cout, Cin, k, k): fan_out = kn * Cin * k * k
    fan_out = kernel_number * in_channels * 9
    std = (2.0 / fan_out) ** 0.5
    branch_weights = [
        std * jax.random.normal(
            keys[i], (kernel_number, out_channels, in_channels, 3, 3), jnp.float32)
        for i in range(3)
    ]
    routing = {
        "w_alpha": 0.1 * jax.random.normal(keys[3], (in_channels, kernel_number), jnp.float32),
        "b_alpha": jnp.zeros((kernel_number,), jnp.float32),
        "w_theta": 0.1 * jax.random.normal(keys[4], (in_channels, kernel_number), jnp.float32),
        "b_theta": jnp.zeros((kernel_number,), jnp.float32),
    }
    return {"branch_weights": branch_weights, "routing": routing}


if __name__ == "__main__":
    key = jax.random.PRNGKey(0)
    k_x, k_p = jax.random.split(key)

    bs, Cin, Cout, H, W = 2, 4, 8, 16, 16
    kernel_number = 2

    x = jax.random.normal(k_x, (bs, Cin, H, W), jnp.float32)
    params = init_params(k_p, Cin, Cout, kernel_number)

    # Path 1: deep-K im2col matmul (what small Cin selects automatically), auto row tile.
    fwd_im2col = jax.jit(functools.partial(multi_scale_rotated_conv2d,
                                           use_pallas=True, use_im2col=True))
    # Path 2: per-tap accumulate path (the large-Cin production path), forced 2 row tiles
    # so the pipelined halo rows are exercised.
    fwd_acc = jax.jit(functools.partial(multi_scale_rotated_conv2d,
                                        use_pallas=True, use_im2col=False, row_tile=8))
    fwd_ref = jax.jit(functools.partial(multi_scale_rotated_conv2d, use_pallas=False))

    out_a = jax.block_until_ready(fwd_im2col(x, params))
    out_b = jax.block_until_ready(fwd_acc(x, params))
    ref = jax.block_until_ready(fwd_ref(x, params))

    assert out_a.shape == (bs, 3 * Cout, H, W), out_a.shape
    assert out_b.shape == (bs, 3 * Cout, H, W), out_b.shape
    err_a = float(jnp.max(jnp.abs(out_a - ref)))
    err_b = float(jnp.max(jnp.abs(out_b - ref)))
    assert bool(jnp.allclose(out_a, ref, atol=2e-2, rtol=2e-2)), err_a
    assert bool(jnp.allclose(out_b, ref, atol=2e-2, rtol=2e-2)), err_b

    print("KERNEL_OK")
</pallas_src>

<mosaic_0001>
module attributes {stable_mosaic.version = 11 : i64} {
  func.func @_rotconv_im2col_kernel(%arg0: i32, %arg1: i32, %arg2: memref<1x16x24x4xbf16, #tpu.memory_space<vmem>>, %arg3: memref<1x2x24x4xbf16, #tpu.memory_space<vmem>>, %arg4: memref<1x36x24xbf16, #tpu.memory_space<vmem>>, %arg5: memref<1x256x24xf32, #tpu.memory_space<vmem>>) attributes {dimension_semantics = [#tpu.dimension_semantics<parallel>, #tpu.dimension_semantics<parallel>], iteration_bounds = array<i64: 2, 1>, scalar_prefetch = 0 : i64, scratch_operands = 0 : i64, tpu.core_type = #tpu.core_type<tc>, window_params = [{transform_indices = @transform_0, window_bounds = array<i64: 1, 16, 24, 4>}, {transform_indices = @transform_1, window_bounds = array<i64: 1, 2, 24, 4>}, {transform_indices = @transform_2, window_bounds = array<i64: 1, 36, 24>}, {transform_indices = @transform_3, window_bounds = array<i64: 1, 256, 24>}]} {
    %c0 = arith.constant 0 : index
    %c0_0 = arith.constant 0 : index
    %c0_1 = arith.constant 0 : index
    %c0_2 = arith.constant 0 : index
    %0 = vector.load %arg2[%c0, %c0_0, %c0_1, %c0_2] : memref<1x16x24x4xbf16, #tpu.memory_space<vmem>>, vector<1x16x24x4xbf16>
    %1 = vector.shape_cast %0 : vector<1x16x24x4xbf16> to vector<16x24x4xbf16>
    %c0_3 = arith.constant 0 : index
    %c0_4 = arith.constant 0 : index
    %c0_5 = arith.constant 0 : index
    %c0_6 = arith.constant 0 : index
    %2 = vector.load %arg3[%c0_3, %c0_4, %c0_5, %c0_6] : memref<1x2x24x4xbf16, #tpu.memory_space<vmem>>, vector<1x2x24x4xbf16>
    %3 = vector.shape_cast %2 : vector<1x2x24x4xbf16> to vector<2x24x4xbf16>
    %4 = tpu.concatenate %1, %3 in 0 : vector<16x24x4xbf16>, vector<2x24x4xbf16> -> vector<18x24x4xbf16>
    %5 = vector.extract_strided_slice %4 {offsets = [0, 0, 0], sizes = [16, 16, 4], strides = [1, 1, 1]} : vector<18x24x4xbf16> to vector<16x16x4xbf16>
    %6 = vector.extract_strided_slice %4 {offsets = [0, 1, 0], sizes = [16, 16, 4], strides = [1, 1, 1]} : vector<18x24x4xbf16> to vector<16x16x4xbf16>
    %7 = vector.extract_strided_slice %4 {offsets = [0, 2, 0], sizes = [16, 16, 4], strides = [1, 1, 1]} : vector<18x24x4xbf16> to vector<16x16x4xbf16>
    %8 = vector.extract_strided_slice %4 {offsets = [1, 0, 0], sizes = [16, 16, 4], strides = [1, 1, 1]} : vector<18x24x4xbf16> to vector<16x16x4xbf16>
    %9 = vector.extract_strided_slice %4 {offsets = [1, 1, 0], sizes = [16, 16, 4], strides = [1, 1, 1]} : vector<18x24x4xbf16> to vector<16x16x4xbf16>
    %10 = vector.extract_strided_slice %4 {offsets = [1, 2, 0], sizes = [16, 16, 4], strides = [1, 1, 1]} : vector<18x24x4xbf16> to vector<16x16x4xbf16>
    %11 = vector.extract_strided_slice %4 {offsets = [2, 0, 0], sizes = [16, 16, 4], strides = [1, 1, 1]} : vector<18x24x4xbf16> to vector<16x16x4xbf16>
    %12 = vector.extract_strided_slice %4 {offsets = [2, 1, 0], sizes = [16, 16, 4], strides = [1, 1, 1]} : vector<18x24x4xbf16> to vector<16x16x4xbf16>
    %13 = vector.extract_strided_slice %4 {offsets = [2, 2, 0], sizes = [16, 16, 4], strides = [1, 1, 1]} : vector<18x24x4xbf16> to vector<16x16x4xbf16>
    %14 = tpu.concatenate %5, %6, %7, %8, %9, %10, %11, %12, %13 in 2 : vector<16x16x4xbf16>, vector<16x16x4xbf16>, vector<16x16x4xbf16>, vector<16x16x4xbf16>, vector<16x16x4xbf16>, vector<16x16x4xbf16>, vector<16x16x4xbf16>, vector<16x16x4xbf16>, vector<16x16x4xbf16> -> vector<16x16x36xbf16>
    %15 = vector.shape_cast %14 : vector<16x16x36xbf16> to vector<256x36xbf16>
    %c0_7 = arith.constant 0 : index
    %c0_8 = arith.constant 0 : index
    %c0_9 = arith.constant 0 : index
    %16 = vector.load %arg4[%c0_7, %c0_8, %c0_9] : memref<1x36x24xbf16, #tpu.memory_space<vmem>>, vector<1x36x24xbf16>
    %17 = vector.shape_cast %16 : vector<1x36x24xbf16> to vector<36x24xbf16>
    %cst = arith.constant dense<0.000000e+00> : vector<256x24xf32>
    %18 = tpu.matmul %15, %17, %cst {dimension_numbers = #tpu.dot_dimension_numbers<[1], [0], [0], [1], [0, 0, 1, 1], [], []>} : vector<256x36xbf16>, vector<36x24xbf16>, vector<256x24xf32> -> vector<256x24xf32>
    %c0_10 = arith.constant 0 : index
    %c0_11 = arith.constant 0 : index
    %c0_12 = arith.constant 0 : index
    %19 = vector.load %arg5[%c0_10, %c0_11, %c0_12] : memref<1x256x24xf32, #tpu.memory_space<vmem>>, vector<1x256x24xf32>
    %20 = vector.shape_cast %19 : vector<1x256x24xf32> to vector<256x24xf32>
    %21 = vector.shape_cast %18 : vector<256x24xf32> to vector<1x256x24xf32>
    tpu.vector_store %arg5[%c0_10, %c0_11, %c0_12], %21 {strides = array<i32>} : memref<1x256x24xf32, #tpu.memory_space<vmem>>, vector<1x256x24xf32>,
    return
  }
  func.func @transform_0(%arg0: i32, %arg1: i32) -> (i32, i32, i32, i32) {
    %c0_i32 = arith.constant 0 : i32
    %c0_i32_0 = arith.constant 0 : i32
    %c0_i32_1 = arith.constant 0 : i32
    return %arg0, %arg1, %c0_i32, %c0_i32_0 : i32, i32, i32, i32
  }
  func.func @transform_1(%arg0: i32, %arg1: i32) -> (i32, i32, i32, i32) {
    %c1_i32 = arith.constant 1 : i32
    %0 = arith.addi %arg1, %c1_i32 : i32
    %c8_i32 = arith.constant 8 : i32
    %1 = arith.muli %0, %c8_i32 : i32
    %c0_i32 = arith.constant 0 : i32
    %c0_i32_0 = arith.constant 0 : i32
    %c0_i32_1 = arith.constant 0 : i32
    return %arg0, %1, %c0_i32, %c0_i32_0 : i32, i32, i32, i32
  }
  func.func @transform_2(%arg0: i32, %arg1: i32) -> (i32, i32, i32) {
    %c0_i32 = arith.constant 0 : i32
    %c0_i32_0 = arith.constant 0 : i32
    %c0_i32_1 = arith.constant 0 : i32
    return %arg0, %c0_i32, %c0_i32_0 : i32, i32, i32
  }
  func.func @transform_3(%arg0: i32, %arg1: i32) -> (i32, i32, i32) {
    %c0_i32 = arith.constant 0 : i32
    %c0_i32_0 = arith.constant 0 : i32
    return %arg0, %arg1, %c0_i32 : i32, i32, i32
  }
}

</mosaic_0001>

<bundles_post_ra>
// kernel: multi_scale_rotated_conv2d.1
= control target key start
LH: loop header
LB: loop body
LE: loop exit
PB: predicated region body
PF: predicated region fallthrough
CT: control target
= control target key end

     0   :  { %8 = vsyncpa [#allocation3], 0  ;;  %s2893_s0 = inlined_call_operand.vmem [shape: bf16[2,18,24,4], index: 0, kind: input, shape index: {}, may-alias: {0,1}]   ;;  %s2894_s1 = inlined_call_operand.vmem [shape: bf16[2,18,24,4], index: 1, kind: input, shape index: {}, may-alias: {0,1}]   ;;  %s2895_s2 = inlined_call_operand.vmem [shape: bf16[2,36,24], index: 2, kind: input, shape index: {}]   ;;  %s2896_s3 = inlined_call_operand.hbm [shape: f32[2,256,24], index: 3, kind: output, shape index: {}]  }
   0x1   :  { %10 = vsyncpa [#allocation3 + $0x1], 0  ;;  %s2029_s12 = smov 0   ;;  %s2031_s13 = smov 0  }
   0x2   :  { %s2033_s14 = smov 0   ;;  %s2035_s15 = smov 0  }
   0x3   :  { %s2037_s16 = smov 0   ;;  %s2039_s17 = smov 0  }
   0x4 LB: > { %s1673_s18 = sadd.s32 4294967295, %s1997_s17   ;;  %s1674_s19 = sadd.s32 4294967294, %s1997_s17   ;;  %s1997_s17 = sphi %s2039_s17, %s16_s17   ;;  %s1993_s16 = sphi %s2037_s16, %s2903_s16   ;;  %s1989_s15 = sphi %s2035_s15, %s2902_s15   ;;  %s1985_s14 = sphi %s2033_s14, %s2901_s14   ;;  %s1981_s13 = sphi %s2031_s13, %s2900_s13   ;;  %s1977_s12 = sphi %s2029_s12, %s2899_s12  }
   0x5   : > { %s28_s20 = sadd.s32 1, %s1993_s16  ;;  %s123_s21 = sadd.s32 1, %s1985_s14 }
   0x6   : > { %p30_p0 = scmp.ge.s32.totalorder %s28_s20, 2  ;;  %p133_p1 = scmp.ne.s32.totalorder %s1985_s14, %s1981_s13 }
   0x7   : > { %p134_p2 = scmp.eq.s32.totalorder %s1673_s18, 1  ;;  %p139_p3 = scmp.ne.s32.totalorder %s1981_s13, %s1977_s12 }
   0x8   : > { %s2905_s20 = smov (%p30_p0, %s28_s20), 0  ;;  %p140_p5 = scmp.eq.s32.totalorder %s1674_s19, 1 }
   0x9   : > { %p2069_p4 = por %p134_p2, %p133_p1  ;;  %s118_s23 = ssub.s32 %s1993_s16, %s2905_s20 }
   0xa   : > { %p1677_p6 = scmp.ge.s32.totalorder %s1997_s17, 1  ;;  %p121_p7 = scmp.eq.s32.totalorder %s118_s23, 0 }
   0xb   : > { %p2076_p8 = por %p140_p5, %p139_p3  ;;  %p208_p9 = scmp.lt.s32.totalorder %s1997_s17, 3 }
   0xc   : > { %s2082_s25 = scalar_select %p121_p7, %s1985_s14, %s123_s21  }
   0xd   : > { %p209_p10 = pnand %p1677_p6, %p208_p9 }
   0xe   : > { %p265_p11 = scmp.lt.s32.totalorder (!%p209_p10), %s1989_s15, 1  ;;  %vm709_vm0 = vcmask (!%p209_p10), 1046528   ;;  %s1999_s4 = smov (!%p209_p10), 12   ;;  %vm484_vm1 = vsmask.f32 (!%p209_p10), 7424  ;;  %vm1345_vm2 = vcmask (!%p209_p10), 1041408  }
   0xf   : > { %212 = sbr.rel (%p209_p10) target bundleno = 627 (0x273), region = 32  ;;  %s2000_s5 = smov (!%p209_p10), 8   ;;  %vm1028_vm3 = vcmask (!%p209_p10), 31744   ;;  %vm1061_vm4 = vcmask (!%p209_p10), 64512   ;;  %vm1127_vm5 = vcmask (!%p209_p10), 130048   ;;  %vm1094_vm6 = vcmask (!%p209_p10), 97280  }
  0x10   : > { %s2001_s6 = smov (!%p209_p10), 4   ;;  %s2002_s7 = smov (!%p209_p10), 16   ;;  %vm1160_vm7 = vcmask (!%p209_p10), 162816   ;;  %vm1193_vm8 = vcmask (!%p209_p10), 195584   ;;  %vm1226_vm9 = vcmask (!%p209_p10), 228352   ;;  %vm1259_vm10 = vcmask (!%p209_p10), 261120  }
  0x11   : > { %s2003_s8 = smov (!%p209_p10), 20   ;;  %s2004_s19 = smov (!%p209_p10), 24   ;;  %vm1312_vm11 = vcmask (!%p209_p10), 293888  }
  0x12   : > { %s2005_s21 = smov (!%p209_p10), 28   ;;  %s2006_s23 = smov (!%p209_p10), 32  }
  0x16   : > { %s2086_s26 = scalar_select %p265_p11, %s1989_s15, 1 }
  0x18   : > { %s1810_s27 = smul.u32 216, %s2086_s26 }
  0x19   : > { %s1812_s9 = smul.u32 20, %s2086_s26  ;;  %s256_s26 = sand.u32 1, %s1981_s13  }
  0x1a   : > { %s2094_s30 = scalar_lea.vmem %s2893_s0, %s1810_s27  ;;  %s1743_s28 = sadd.s32 192, %s1810_s27 }
  0x1b   : > { %v2097_v0 = vld [vmem:[%s2094_s30 + $0x6c] sm:$0xff]   ;;  %v2107_v2 = vld [vmem:[%s2094_s30 + $0x60] sm:$0xff]   ;;  %v1881_v3 = vld [vmem:[%s2094_s30 + $0x68] ss:$0 sps:$4 sm:$0xff]   ;;  %s299_s18 = scalar_lea.vmem %s2895_s2, %s1812_s9  ;;  %s2275_s10 = scalar_lea.vmem %s2894_s1, %s1743_s28 }
  0x1c   : > { %v2100_v1 = vld [vmem:[%s2094_s30 + $0xc] sm:$0xff]   ;;  %811 = vrot.lane.b32.xlu1 %v2097_v0, %s1999_s4  ;;  %v737_v4 = vrot.slane %v2097_v0, 1  ;;  %v2112_v5 = vld [vmem:[%s2094_s30] sm:$0xff]   ;;  %v734_v7 = vrot.slane %v2107_v2, 1  ;;  %v735_v8 = vrot.slane %v1881_v3, 1  ;;  %v594_v21 = vshrl.u32 %v2097_v0, 16 }
  0x1d   : > { %795 = vrot.lane.b32.xlu0 %v2100_v1, %s1999_s4  ;;  %v713_v6 = vrot.slane %v2100_v1, 1  ;;  %v1883_v9 = vld [vmem:[%s2094_s30 + $0x8] ss:$0 sps:$4 sm:$0xff]   ;;  %v710_v10 = vrot.slane %v2112_v5, 1  ;;  %v1884_v11 = vld [vmem:[%s2094_s30 + $0x74] ss:$0 sps:$4 sm:$0xff]  }
  0x1e   : > { %v498_v12 = vshrl.u32 %v2100_v1, 16  ;;  %v2121_v13 = vsel %vm709_vm0, %v734_v7, %v735_v8  ;;  %v711_v14 = vrot.slane %v1883_v9, 1  ;;  %v1885_v15 = vld [vmem:[%s2094_s30 + $0x14] ss:$0 sps:$4 sm:$0xff]   ;;  %v500_v16 = vshll.u32 %v2100_v1, 16  ;;  %v2143_v41 = vld [vmem:[%s2094_s30 + $0x78] sm:$0xff]  }
  0x1f   : > { %v486_v17 = vshrl.u32 %v2112_v5, 16  ;;  %v738_v18 = vrot.slane %v1884_v11, 1  ;;  %v488_v19 = vshll.u32 %v2112_v5, 16  ;;  %v493_v20 = vshll.u32 %v1883_v9, 16  ;;  %v2148_v46 = vld [vmem:[%s2094_s30 + $0x18] sm:$0xff]   ;;  %s1678_s27 = sshll.u32 %s256_s26, 8 }
  0x20   : > { %774 = vrot.lane.b32.xlu1 %v2121_v13, %s2000_s5  ;;  %v712_v22 = vsel %vm709_vm0, %v710_v10, %v711_v14  ;;  %v714_v23 = vrot.slane %v1885_v15, 1  ;;  %v502_v24 = vrot.slane %v500_v16, 1  ;;  %v505_v25 = vshll.u32 %v1885_v15, 16  ;;  %v1888_v49 = vld [vmem:[%s2094_s30 + $0x80] ss:$0 sps:$4 sm:$0xff]   ;;  %v2190_v10 = vld [vmem:[%s2094_s30 + $0x84] sm:$0xff]  }
  0x21   : > { %758 = vrot.lane.b32.xlu0 %v712_v22, %s2000_s5  ;;  %v2133_v26 = vsel %vm709_vm0, %v737_v4, %v738_v18  ;;  %v490_v27 = vrot.slane %v488_v19, 1  ;;  %v495_v28 = vrot.slane %v493_v20, 1  ;;  %v596_v29 = vshll.u32 %v2097_v0, 16  ;;  %v1889_v52 = vld [vmem:[%s2094_s30 + $0x20] ss:$0 sps:$4 sm:$0xff]   ;;  %v2200_v14 = vld [vmem:[%s2094_s30 + $0x24] sm:$0xff]  }
  0x22   : > { %v715_v30 = vsel %vm709_vm0, %v713_v6, %v714_v23  ;;  %v503_v31 = vor.u32 %v502_v24, %v498_v12  ;;  %v507_v32 = vrot.slane %v505_v25, 1  ;;  %v601_v33 = vshll.u32 %v1884_v11, 16  ;;  %v1892_v15 = vld [vmem:[%s2094_s30 + $0x8c] ss:$0 sps:$4 sm:$0xff]   ;;  %v1906_v22 = vld [vmem:[%s299_s18] sm:$0xff]   ;;  %s2846_s11 = scalar_lea.sflag [#allocation3], %s256_s26 }
  0x23   : > { %v491_v34 = vor.u32 %v490_v27, %v486_v17  ;;  %v598_v35 = vrot.slane %v596_v29, 1  ;;  %v582_v36 = vshrl.u32 %v2107_v2, 16  ;;  %v584_v37 = vshll.u32 %v2107_v2, 16  ;;  %v1893_v19 = vld [vmem:[%s2094_s30 + $0x2c] ss:$0 sps:$4 sm:$0xff]   ;;  %1764 = vmatprep.subr.bf16.mxu0 %v1906_v22  ;;  %1802 = vmatprep.subr.bf16.mxu1 %v1906_v22 }
  0x24   : > { %776 = vrot.lane.b32.xlu1 %v2133_v26, %s2000_s5  ;;  %v508_v38 = vsel %vm484_vm1, %v503_v31, %v507_v32  ;;  %v603_v39 = vrot.slane %v601_v33, 1  ;;  %v589_v40 = vshll.u32 %v1881_v3, 16  ;;  %v608_v50 = vshll.u32 %v2143_v41, 16  ;;  %1765 = vmatpush3.bf16.msra.mxu0 %v1906_v22  ;;  %v1907_v27 = vld [vmem:[%s299_s18 + $0x8] sm:$0xff]  }
  0x25   : > { %760 = vrot.lane.b32.xlu0 %v715_v30, %s2000_s5  ;;  %v599_v42 = vor.u32 %v598_v35, %v594_v21  ;;  %v586_v43 = vrot.slane %v584_v37, 1  ;;  %v496_v44 = vsel %vm484_vm1, %v491_v34, %v495_v28  ;;  %v512_v53 = vshll.u32 %v2148_v46, 16  ;;  %1805 = vmatpush3.bf16.msra.mxu1 %v1906_v22  ;;  %v1910_v32 = vld [vmem:[%s299_s18 + $0x10] ss:$0 sps:$4 sm:$0x33]  }
  0x26   : > { %v591_v45 = vrot.slane %v589_v40, 1  ;;  %v606_v54 = vshrl.u32 %v2143_v41, 16  ;;  %v610_v55 = vrot.slane %v608_v50, 1  ;;  %v613_v56 = vshll.u32 %v1888_v49, 16  ;;  %1766 = vmatprep.subr.bf16.mxu0 %v1907_v27  ;;  %1803 = vmatprep.subr.bf16.mxu1 %v1907_v27 }
  0x27   : > { %v587_v47 = vor.u32 %v586_v43, %v582_v36  ;;  %v2152_v48 = vsel %vm484_vm1, %v599_v42, %v603_v39  ;;  %v510_v57 = vshrl.u32 %v2148_v46, 16  ;;  %v514_v58 = vrot.slane %v512_v53, 1  ;;  %v2251_v43 = vld [vmem:[%s2094_s30 + $0x90] sm:$0xff]  }
  0x28   : > { %679 = vrot.lane.b32.xlu1 %v508_v38, %s2001_s6  ;;  %v517_v59 = vshll.u32 %v1889_v52, 16  ;;  %v611_v60 = vor.u32 %v610_v55, %v606_v54  ;;  %v615_v61 = vrot.slane %v613_v56, 1  ;;  %v740_v6 = vrot.slane %v2143_v41, 1  ;;  %1767 = vmatpush3.bf16.msra.mxu0 %v1907_v27 }
  0x29   : > { %677 = vrot.lane.b32.xlu0 %v496_v44, %s2001_s6  ;;  %v2158_v51 = vsel %vm484_vm1, %v587_v47, %v591_v45  ;;  %v515_v62 = vor.u32 %v514_v58, %v510_v57  ;;  %v741_v7 = vrot.slane %v1888_v49, 1  ;;  %v716_v8 = vrot.slane %v2148_v46, 1  ;;  %1806 = vmatpush3.bf16.msra.mxu1 %v1907_v27  ;;  %v2256_v44 = vld [vmem:[%s2094_s30 + $0x30] sm:$0xff]   ;;  %v1896_v45 = vld [vmem:[%s2094_s30 + $0x98] ss:$0 sps:$4 sm:$0xff]  }
  0x2a   : > { %v519_v63 = vrot.slane %v517_v59, 1  ;;  %v2175_v3 = vsel %vm484_vm1, %v611_v60, %v615_v61  ;;  %v717_v9 = vrot.slane %v1889_v52, 1  ;;  %v620_v16 = vshll.u32 %v2190_v10, 16  ;;  %1808 = vmatprep.subr.msk.bf16.mxu0 %vm1345_vm2, %v1910_v32  ;;  %1809 = vmatprep.subr.msk.bf16.mxu1 %vm1345_vm2, %v1910_v32  ;;  %v1897_v49 = vld [vmem:[%s2094_s30 + $0x38] ss:$0 sps:$4 sm:$0xff]  }
  0x2b   : > { %v2193_v11 = vsel %vm709_vm0, %v740_v6, %v741_v7  ;;  %v618_v17 = vshrl.u32 %v2190_v10, 16  ;;  %v625_v18 = vshll.u32 %v1892_v15, 16  ;;  %v524_v20 = vshll.u32 %v2200_v14, 16 }
  0x2c   : > { %695 = vrot.lane.b32.xlu1 %v2152_v48, %s2001_s6  ;;  %v2179_v4 = vsel %vm484_vm1, %v515_v62, %v519_v63  ;;  %v2197_v12 = vsel %vm709_vm0, %v716_v8, %v717_v9  ;;  %v622_v21 = vrot.slane %v620_v16, 1  ;;  %v522_v23 = vshrl.u32 %v2200_v14, 16  ;;  %v2292_v9 = vld [vmem:[%s2094_s30 + $0x9c] sm:$0xff]  }
  0x2d   : > { %693 = vrot.lane.b32.xlu0 %v2158_v51, %s2001_s6  ;;  %v526_v24 = vrot.slane %v524_v20, 1  ;;  %v529_v25 = vshll.u32 %v1893_v19, 16  ;;  %v627_v29 = vrot.slane %v625_v18, 1  ;;  %v1347_v34 = vsel %vm1345_vm2, %v1910_v32, 0 }
  0x2e   : > { %v623_v28 = vor.u32 %v622_v21, %v618_v17  ;;  %1769 = vmatpush3.bf16.msra.mxu0 %v1347_v34  ;;  %1807 = vmatpush3.bf16.msra.mxu1 %v1347_v34  ;;  %v743_v36 = vrot.slane %v2190_v10, 1  ;;  %v744_v37 = vrot.slane %v1892_v15, 1  ;;  %v720_v39 = vrot.slane %v1893_v19, 1  ;;  %v1900_v15 = vld [vmem:[%s2094_s30 + $0xa4] ss:$0 sps:$4 sm:$0xff]  }
  0x2f   : > { %v531_v31 = vrot.slane %v529_v25, 1  ;;  %v632_v47 = vshll.u32 %v2251_v43, 16  ;;  %v536_v50 = vshll.u32 %v2256_v44, 16  ;;  %v637_v52 = vshll.u32 %v1896_v45, 16  ;;  %v1901_v17 = vld [vmem:[%s2094_s30 + $0x44] ss:$0 sps:$4 sm:$0xff]  }
  0x30   : > { %813 = vrot.lane.b32.xlu1 %v2143_v41, %s1999_s4  ;;  %v628_v33 = vsel %vm484_vm1, %v623_v28, %v627_v29  ;;  %v745_v40 = vsel %vm709_vm0, %v743_v36, %v744_v37  ;;  %v630_v53 = vshrl.u32 %v2251_v43, 16  ;;  %v534_v55 = vshrl.u32 %v2256_v44, 16 }
  0x31   : > { %797 = vrot.lane.b32.xlu0 %v2148_v46, %s1999_s4  ;;  %v634_v54 = vrot.slane %v632_v47, 1  ;;  %v538_v56 = vrot.slane %v536_v50, 1  ;;  %v541_v57 = vshll.u32 %v1897_v49, 16  ;;  %v639_v58 = vrot.slane %v637_v52, 1 }
  0x32   : > { %v722_v6 = vrot.slane %v2256_v44, 1  ;;  %v723_v7 = vrot.slane %v1897_v49, 1  ;;  %v644_v16 = vshll.u32 %v2292_v9, 16  ;;  %v642_v19 = vshrl.u32 %v2292_v9, 16 }
  0x33   : > { %v635_v59 = vor.u32 %v634_v54, %v630_v53  ;;  %v539_v60 = vor.u32 %v538_v56, %v534_v55  ;;  %v543_v61 = vrot.slane %v541_v57, 1  ;;  %v649_v21 = vshll.u32 %v1900_v15, 16  ;;  %v2358_v56 = vld [vmem:[%s2094_s30 + $0xa8] sm:$0xff]  }
  0x34   : > { %858 = vrot.lane.b32.xlu1 %v2152_v48, %s2002_s7  ;;  %v646_v20 = vrot.slane %v644_v16, 1  ;;  %v749_v36 = vrot.slane %v2292_v9, 1  ;;  %v750_v37 = vrot.slane %v1900_v15, 1 }
  0x35   : > { %842 = vrot.lane.b32.xlu0 %v508_v38, %s2002_s7  ;;  %v719_v38 = vrot.slane %v2200_v14, 1  ;;  %v640_v62 = vsel %vm484_vm1, %v635_v59, %v639_v58  ;;  %v544_v63 = vsel %vm484_vm1, %v539_v60, %v543_v61  ;;  %v651_v27 = vrot.slane %v649_v21, 1  ;;  %v2364_v58 = vld [vmem:[%s2094_s30 + $0x48] sm:$0xff]   ;;  %v1904_v60 = vld [vmem:[%s2094_s30 + $0xb0] ss:$0 sps:$4 sm:$0xff]  }
  0x36   : > { %v647_v25 = vor.u32 %v646_v20, %v642_v19  ;;  %v656_v61 = vshll.u32 %v2358_v56, 16  ;;  %v558_v15 = vshrl.u32 %v2364_v58, 16 }
  0x37   : > { %v721_v42 = vsel %vm709_vm0, %v719_v38, %v720_v39 }
  0x38   : > { %860 = vrot.lane.b32.xlu1 %v2175_v3, %s2002_s7 }
  0x39   : > { %844 = vrot.lane.b32.xlu0 %v2179_v4, %s2002_s7 }
  0x3c   : > { %893 = vrot.lane.b32.xlu1 %v2133_v26, %s2003_s8 }
  0x3d   : > { %877 = vrot.lane.b32.xlu0 %v715_v30, %s2003_s8  ;;  %v527_v30 = vor.u32 %v526_v24, %v522_v23  ;;  %v553_v24 = vshll.u32 %v1901_v17, 16 }
  0x3f   : > { %v532_v35 = vsel %vm484_vm1, %v527_v30, %v531_v31  ;;  %v555_v29 = vrot.slane %v553_v24, 1  ;;  %v652_v31 = vsel %vm484_vm1, %v647_v25, %v651_v27 }
  0x40   : > { %895 = vrot.lane.b32.xlu1 %v2193_v11, %s2003_s8 }
  0x41   : > { %879 = vrot.lane.b32.xlu0 %v2197_v12, %s2003_s8 }
  0x44   : > { %930 = vrot.lane.b32.xlu1 %v2143_v41, %s2004_s19 }
  0x45   : > { %914 = vrot.lane.b32.xlu0 %v2148_v46, %s2004_s19 }
  0x48   : > { %932 = vrot.lane.b32.xlu1 %v2190_v10, %s2004_s19 }
  0x49   : > { %916 = vrot.lane.b32.xlu0 %v2200_v14, %s2004_s19 }
  0x4c   : > { %977 = vrot.lane.b32.xlu1 %v2175_v3, %s2005_s21 }
  0x4d   : > { %961 = vrot.lane.b32.xlu0 %v2179_v4, %s2005_s21 }
  0x50   : > { %979 = vrot.lane.b32.xlu1 %v628_v33, %s2005_s21 }
  0x51   : > { %963 = vrot.lane.b32.xlu0 %v532_v35, %s2005_s21 }
  0x54   : > { %1012 = vrot.lane.b32.xlu1 %v2193_v11, %s2006_s23 }
  0x55   : > { %996 = vrot.lane.b32.xlu0 %v2197_v12, %s2006_s23 }
  0x58   : > { %697 = vrot.lane.b32.xlu1 %v2175_v3, %s2001_s6  ;;  %v746_v3 = vrot.slane %v2251_v43, 1 }
  0x59   : > { %681 = vrot.lane.b32.xlu0 %v2179_v4, %s2001_s6  ;;  %v747_v4 = vrot.slane %v1896_v45, 1  ;;  %v751_v45 = vsel %vm709_vm0, %v749_v36, %v750_v37  ;;  %v752_v36 = vrot.slane %v2358_v56, 1  ;;  %v753_v37 = vrot.slane %v1904_v60, 1 }
  0x5b   : > { %v748_v8 = vsel %vm709_vm0, %v746_v3, %v747_v4  ;;  %v560_v3 = vshll.u32 %v2364_v58, 16 }
  0x5c   : > { %1014 = vrot.lane.b32.xlu1 %v745_v40, %s2006_s23 }
  0x5d   : > { %998 = vrot.lane.b32.xlu0 %v721_v42, %s2006_s23  ;;  %v562_v16 = vrot.slane %v560_v3, 1  ;;  %v2420_v3 = vld [vmem:[%s2094_s30 + $0xb4] sm:$0xff]  }
  0x60   : > { %699 = vrot.lane.b32.xlu1 %v628_v33, %s2001_s6 }
  0x61   : > { %683 = vrot.lane.b32.xlu0 %v532_v35, %s2001_s6 }
  0x64   : > { %778 = vrot.lane.b32.xlu1 %v2193_v11, %s2000_s5  ;;  %v724_v11 = vsel %vm709_vm0, %v722_v6, %v723_v7  ;;  %v654_v6 = vshrl.u32 %v2358_v56, 16  ;;  %v658_v7 = vrot.slane %v656_v61, 1 }
  0x65   : > { %762 = vrot.lane.b32.xlu0 %v2197_v12, %s2000_s5  ;;  %v2297_v12 = vld [vmem:[%s2094_s30 + $0x3c] sm:$0xff]  }
  0x66   : > { %v548_v18 = vshll.u32 %v2297_v12, 16  ;;  %v546_v22 = vshrl.u32 %v2297_v12, 16  ;;  %v725_v39 = vrot.slane %v2297_v12, 1  ;;  %v659_v19 = vor.u32 %v658_v7, %v654_v6 }
  0x68   : > { %780 = vrot.lane.b32.xlu1 %v745_v40, %s2000_s5  ;;  %v550_v23 = vrot.slane %v548_v18, 1 }
  0x69   : > { %764 = vrot.lane.b32.xlu0 %v721_v42, %s2000_s5 }
  0x6a   : > { %v551_v28 = vor.u32 %v550_v23, %v546_v22  ;;  %v563_v22 = vor.u32 %v562_v16, %v558_v15 }
  0x6c   : > { %815 = vrot.lane.b32.xlu1 %v2190_v10, %s1999_s4 }
  0x6d   : > { %799 = vrot.lane.b32.xlu0 %v2200_v14, %s1999_s4 }
  0x70   : > { %817 = vrot.lane.b32.xlu1 %v2251_v43, %s1999_s4 }
  0x71   : > { %801 = vrot.lane.b32.xlu0 %v2256_v44, %s1999_s4 }
  0x74   : > { %862 = vrot.lane.b32.xlu1 %v628_v33, %s2002_s7  ;;  %v556_v33 = vsel %vm484_vm1, %v551_v28, %v555_v29 }
  0x75   : > { %846 = vrot.lane.b32.xlu0 %v532_v35, %s2002_s7 }
  0x78   : > { %864 = vrot.lane.b32.xlu1 %v640_v62, %s2002_s7 }
  0x79   : > { %848 = vrot.lane.b32.xlu0 %v544_v63, %s2002_s7 }
  0x7c   : > { %897 = vrot.lane.b32.xlu1 %v745_v40, %s2003_s8  ;;  %v726_v40 = vrot.slane %v1901_v17, 1 }
  0x7d   : > { %881 = vrot.lane.b32.xlu0 %v721_v42, %s2003_s8 }
  0x7e   : > { %v2343_v49 = vsel %vm709_vm0, %v725_v39, %v726_v40 }
  0x80   : > { %899 = vrot.lane.b32.xlu1 %v748_v8, %s2003_s8 }
  0x81   : > { %883 = vrot.lane.b32.xlu0 %v724_v11, %s2003_s8 }
  0x84   : > { %934 = vrot.lane.b32.xlu1 %v2251_v43, %s2004_s19 }
  0x85   : > { %918 = vrot.lane.b32.xlu0 %v2256_v44, %s2004_s19 }
  0x88   : > { %936 = vrot.lane.b32.xlu1 %v2292_v9, %s2004_s19 }
  0x89   : > { %920 = vrot.lane.b32.xlu0 %v2297_v12, %s2004_s19 }
  0x8c   : > { %981 = vrot.lane.b32.xlu1 %v640_v62, %s2005_s21 }
  0x8d   : > { %965 = vrot.lane.b32.xlu0 %v544_v63, %s2005_s21 }
  0x8e   : > { %v2316_v30 = vpop.permute.xlu1 %811 }
  0x8f   : > { %v2320_v32 = vpop.permute.xlu0 %795 }
  0x90   : > { %983 = vrot.lane.b32.xlu1 %v652_v31, %s2005_s21 }
  0x91   : > { %967 = vrot.lane.b32.xlu0 %v556_v33, %s2005_s21 }
  0x92   : > { %v2325_v34 = vpop.permute.xlu1 %774 }
  0x93   : > { %v2327_v35 = vpop.permute.xlu0 %758 }
  0x94   : > { %1016 = vrot.lane.b32.xlu1 %v748_v8, %s2006_s23 }
  0x95   : > { %1000 = vrot.lane.b32.xlu0 %v724_v11, %s2006_s23 }
  0x96   : > { %v2332_v38 = vpop.permute.xlu1 %776 }
  0x97   : > { %v2335_v42 = vpop.permute.xlu0 %760 }
  0x98   : > { %701 = vrot.lane.b32.xlu1 %v640_v62, %s2001_s6 }
  0x99   : > { %685 = vrot.lane.b32.xlu0 %v544_v63, %s2001_s6  ;;  %v1905_v63 = vld [vmem:[%s2094_s30 + $0x50] ss:$0 sps:$4 sm:$0xff]  }
  0x9a   : > { %v2340_v47 = vpop.permute.xlu1 %679  ;;  %v565_v17 = vshll.u32 %v1905_v63, 16  ;;  %v729_v39 = vrot.slane %v1905_v63, 1 }
  0x9b   : > { %v678_v50 = vpop.permute.xlu0 %677 }
  0x9c   : > { %1018 = vrot.lane.b32.xlu1 %v751_v45, %s2006_s23  ;;  %v567_v23 = vrot.slane %v565_v17, 1  ;;  %v1030_v6 = vsel %vm1028_vm3, %v2112_v5, %v678_v50 }
  0x9d   : > { %1002 = vrot.lane.b32.xlu0 %v2343_v49, %s2006_s23  ;;  %v1063_v5 = vsel %vm1061_vm4, %v1030_v6, %v2327_v35  ;;  %v2449_v35 = vld [vmem:[%s2094_s30 + $0x5c] ss:$0 sps:$4 sm:$0xff]  }
  0x9e   : > { %v2348_v52 = vpop.permute.xlu1 %695  ;;  %v2401_v28 = vsel %vm484_vm1, %v563_v22, %v567_v23  ;;  %v666_v22 = vshrl.u32 %v2420_v3, 16 }
  0x9f   : > { %v694_v53 = vpop.permute.xlu0 %693 }
  0xa0   : > { %703 = vrot.lane.b32.xlu1 %v652_v31, %s2001_s6  ;;  %v1046_v40 = vsel %vm1028_vm3, %v2107_v2, %v694_v53 }
  0xa1   : > { %687 = vrot.lane.b32.xlu0 %v556_v33, %s2001_s6  ;;  %v1079_v53 = vsel %vm1061_vm4, %v1046_v40, %v2325_v34  ;;  %v668_v34 = vshll.u32 %v2420_v3, 16 }
  0xa2   : > { %v2352_v54 = vpop.permute.xlu1 %813  ;;  %v1112_v50 = vsel %vm1094_vm6, %v1079_v53, %v2316_v30  ;;  %v577_v53 = vshll.u32 %v2449_v35, 16 }
  0xa3   : > { %v2354_v55 = vpop.permute.xlu0 %797 }
  0xa4   : > { %782 = vrot.lane.b32.xlu1 %v748_v8, %s2000_s5  ;;  %v661_v8 = vshll.u32 %v1904_v60, 16  ;;  %v2417_v60 = vsel %vm709_vm0, %v752_v36, %v753_v37  ;;  %v670_v36 = vrot.slane %v668_v34, 1 }
  0xa5   : > { %766 = vrot.lane.b32.xlu0 %v724_v11, %s2000_s5 }
  0xa6   : > { %v2361_v57 = vpop.permute.xlu1 %858  ;;  %v663_v20 = vrot.slane %v661_v8, 1 }
  0xa7   : > { %v2366_v59 = vpop.permute.xlu0 %842  ;;  %v1145_v16 = vsel %vm1127_vm5, %v1112_v50, %v2361_v57 }
  0xa8   : > { %784 = vrot.lane.b32.xlu1 %v751_v45, %s2000_s5  ;;  %v2397_v25 = vsel %vm484_vm1, %v659_v19, %v663_v20  ;;  %v1096_v19 = vsel %vm1094_vm6, %v1063_v5, %v2320_v32  ;;  %v1048_v32 = vsel %vm1028_vm3, %v2097_v0, %v2348_v52  ;;  %v1032_v0 = vsel %vm1028_vm3, %v2100_v1, %v2340_v47 }
  0xa9   : > { %768 = vrot.lane.b32.xlu0 %v2343_v49, %s2000_s5  ;;  %v1129_v57 = vsel %vm1127_vm5, %v1096_v19, %v2366_v59  ;;  %v671_v5 = vor.u32 %v670_v36, %v666_v22  ;;  %v1065_v47 = vsel %vm1061_vm4, %v1032_v0, %v2335_v42 }
  0xaa   : > { %v2373_v62 = vpop.permute.xlu1 %860 }
  0xab   : > { %v2377_v4 = vpop.permute.xlu0 %844 }
  0xac   : > { %819 = vrot.lane.b32.xlu1 %v2292_v9, %s1999_s4 }
  0xad   : > { %803 = vrot.lane.b32.xlu0 %v2297_v12, %s1999_s4 }
  0xae   : > { %v894_v11 = vpop.permute.xlu1 %893 }
  0xaf   : > { %v2385_v18 = vpop.permute.xlu0 %877  ;;  %v1178_v20 = vsel %vm1160_vm7, %v1145_v16, %v894_v11  ;;  %v579_v16 = vrot.slane %v577_v53, 1  ;;  %v1913_v53 = vld [vmem:[%s2275_s10] sm:$0xff]  }
  0xb0   : > { %821 = vrot.lane.b32.xlu1 %v2358_v56, %s1999_s4  ;;  %v1162_v11 = vsel %vm1160_vm7, %v1129_v57, %v2385_v18 }
  0xb1   : > { %805 = vrot.lane.b32.xlu0 %v2364_v58, %s1999_s4 }
  0xb2   : > { %v2391_v21 = vpop.permute.xlu1 %895 }
  0xb3   : > { %v2393_v24 = vpop.permute.xlu0 %879 }
  0xb4   : > { %866 = vrot.lane.b32.xlu1 %v652_v31, %s2002_s7 }
  0xb5   : > { %850 = vrot.lane.b32.xlu0 %v556_v33, %s2002_s7  ;;  %v728_v33 = vrot.slane %v2364_v58, 1 }
  0xb6   : > { %v931_v27 = vpop.permute.xlu1 %930 }
  0xb7   : > { %v915_v29 = vpop.permute.xlu0 %914  ;;  %v2429_v7 = vsel %vm709_vm0, %v728_v33, %v729_v39  ;;  %v1211_v23 = vsel %vm1193_vm8, %v1178_v20, %v931_v27 }
  0xb8   : > { %868 = vrot.lane.b32.xlu1 %v2397_v25, %s2002_s7  ;;  %v1195_v27 = vsel %vm1193_vm8, %v1162_v11, %v915_v29  ;;  %v1081_v29 = vsel %vm1061_vm4, %v1048_v32, %v2332_v38 }
  0xb9   : > { %852 = vrot.lane.b32.xlu0 %v2401_v28, %s2002_s7  ;;  %v1114_v50 = vsel %vm1094_vm6, %v1081_v29, %v2352_v54  ;;  %v833_v29 = vshll.u32 %v1913_v53, 16 }
  0xba   : > { %v2408_v31 = vpop.permute.xlu1 %932  ;;  %v1147_v38 = vsel %vm1127_vm5, %v1114_v50, %v2373_v62 }
  0xbb   : > { %v2413_v61 = vpop.permute.xlu0 %916  ;;  %v1180_v54 = vsel %vm1160_vm7, %v1147_v38, %v2391_v21 }
  0xbc   : > { %901 = vrot.lane.b32.xlu1 %v751_v45, %s2003_s8  ;;  %v2432_v45 = vld [vmem:[%s2094_s30 + $0x54] sm:$0xff]   ;;  %v1213_v42 = vsel %vm1193_vm8, %v1180_v54, %v2408_v31 }
  0xbd   : > { %885 = vrot.lane.b32.xlu0 %v2343_v49, %s2003_s8  ;;  %v2439_v49 = vld [vmem:[%s2094_s30 + $0xbc] ss:$0 sps:$4 sm:$0xff]   ;;  %v572_v17 = vshll.u32 %v2432_v45, 16  ;;  %v570_v59 = vshrl.u32 %v2432_v45, 16  ;;  %v731_v11 = vrot.slane %v2432_v45, 1 }
  0xbe   : > { %v978_v63 = vpop.permute.xlu1 %977  ;;  %v673_v37 = vshll.u32 %v2439_v49, 16 }
  0xbf   : > { %v962_v8 = vpop.permute.xlu0 %961  ;;  %v1244_v33 = vsel %vm1226_vm9, %v1211_v23, %v978_v63  ;;  %v574_v6 = vrot.slane %v572_v17, 1  ;;  %v1098_v17 = vsel %vm1094_vm6, %v1065_v47, %v2354_v55 }
  0xc0   : > { %903 = vrot.lane.b32.xlu1 %v2417_v60, %s2003_s8  ;;  %v1228_v52 = vsel %vm1226_vm9, %v1195_v27, %v962_v8  ;;  %v675_v34 = vrot.slane %v673_v37, 1  ;;  %v1131_v20 = vsel %vm1127_vm5, %v1098_v17, %v2377_v4  ;;  %v756_v37 = vrot.slane %v2439_v49, 1 }
  0xc1   : > { %887 = vrot.lane.b32.xlu0 %v2429_v7, %s2003_s8  ;;  %v575_v8 = vor.u32 %v574_v6, %v570_v59  ;;  %v1164_v22 = vsel %vm1160_vm7, %v1131_v20, %v2393_v24 }
  0xc2   : > { %v980_v15 = vpop.permute.xlu1 %979  ;;  %v676_v62 = vsel %vm484_vm1, %v671_v5, %v675_v34  ;;  %v1197_v57 = vsel %vm1193_vm8, %v1164_v22, %v2413_v61  ;;  %v835_v34 = vrot.slane %v833_v29, 1  ;;  %v874_v22 = vrot.slane %v1913_v53, 1 }
  0xc3   : > { %v964_v30 = vpop.permute.xlu0 %963  ;;  %v1246_v55 = vsel %vm1226_vm9, %v1213_v42, %v980_v15  ;;  %v580_v4 = vsel %vm484_vm1, %v575_v8, %v579_v16 }
  0xc4   : > { %938 = vrot.lane.b32.xlu1 %v2358_v56, %s2004_s19  ;;  %v1230_v31 = vsel %vm1226_vm9, %v1197_v57, %v964_v30  ;;  %v755_v30 = vrot.slane %v2420_v3, 1  ;;  %v2594_v57 = vld [vmem:[%s2275_s10 + $0xc] sm:$0xff]  }
  0xc5   : > { %922 = vrot.lane.b32.xlu0 %v2364_v58, %s2004_s19 }
  0xc6   : > { %v1013_v39 = vpop.permute.xlu1 %1012  ;;  %v757_v59 = vsel %vm709_vm0, %v755_v30, %v756_v37  ;;  %v952_v30 = vshll.u32 %v2594_v57, 16 }
  0xc7   : > { %v1277_v40 = vsel %vm1259_vm10, %v1244_v33, %v1013_v39  ;;  %v997_v18 = vpop.permute.xlu0 %996  ;;  %v732_v33 = vrot.slane %v2449_v35, 1 }
  0xc8   : > { %940 = vrot.lane.b32.xlu1 %v2420_v3, %s2004_s19  ;;  %1786 = vmatprep.mubr.msk.bf16.mxu1 %vm1312_vm11, %v1277_v40  ;;  %v1261_v63 = vsel %vm1259_vm10, %v1228_v52, %v997_v18  ;;  %v1914_v18 = vld [vmem:[%s2275_s10 + $0x8] ss:$0 sps:$4 sm:$0xff]  }
  0xc9   : > { %924 = vrot.lane.b32.xlu0 %v2432_v45, %s2004_s19  ;;  %1770 = vmatprep.mubr.msk.bf16.mxu0 %vm1312_vm11, %v1261_v63  ;;  %v733_v27 = vsel %vm709_vm0, %v731_v11, %v732_v33  ;;  %v838_v50 = vshll.u32 %v1914_v18, 16 }
  0xca   : > { %v2489_v1 = vpop.permute.xlu1 %697 }
  0xcb   : > { %v2499_v19 = vpop.permute.xlu0 %681  ;;  %v840_v8 = vrot.slane %v838_v50, 1 }
  0xcc   : > { %985 = vrot.lane.b32.xlu1 %v2397_v25, %s2005_s21  ;;  %v1034_v37 = vsel %vm1028_vm3, %v2148_v46, %v2499_v19  ;;  %v950_v46 = vshrl.u32 %v2594_v57, 16 }
  0xcd   : > { %969 = vrot.lane.b32.xlu0 %v2401_v28, %s2005_s21 }
  0xce   : > { %v1015_v21 = vpop.permute.xlu1 %1014 }
  0xcf   : > { %v1279_v23 = vsel %vm1259_vm10, %v1246_v55, %v1015_v21  ;;  %v999_v36 = vpop.permute.xlu0 %998 }
  0xd0   : > { %987 = vrot.lane.b32.xlu1 %v676_v62, %s2005_s21  ;;  %1787 = vmatmul.mubr.msk.bf16.vlgmr.msra.gmra.mrb[0].mxu1 %vm1312_vm11, %v1279_v23  ;;  %v1263_v24 = vsel %vm1259_vm10, %v1230_v31, %v999_v36 }
  0xd1   : > { %971 = vrot.lane.b32.xlu0 %v580_v4, %s2005_s21  ;;  %1771 = vmatmul.mubr.msk.bf16.vlgmr.msra.gmra.mrb[0].mxu0 %vm1312_vm11, %v1263_v24  ;;  %v2604_v24 = vld [vmem:[%s2275_s10 + $0x14] ss:$0 sps:$4 sm:$0xff]  }
  0xd2   : > { %v2523_v15 = vpop.permute.xlu1 %699  ;;  %v957_v29 = vshll.u32 %v2604_v24, 16 }
  0xd3   : > { %v2525_v61 = vpop.permute.xlu0 %683 }
  0xd4   : > { %1020 = vrot.lane.b32.xlu1 %v2417_v60, %s2006_s23 }
  0xd5   : > { %1004 = vrot.lane.b32.xlu0 %v2429_v7, %s2006_s23 }
  0xd6   : > { %v779_v32 = vpop.permute.xlu1 %778 }
  0xd7   : > { %v2535_v39 = vpop.permute.xlu0 %762 }
  0xd8   : > { %705 = vrot.lane.b32.xlu1 %v2397_v25, %s2001_s6 }
  0xd9   : > { %689 = vrot.lane.b32.xlu0 %v2401_v28, %s2001_s6 }
  0xda   : > { %v2542_v49 = vpop.permute.xlu1 %780 }
  0xdb   : > { %v2545_v40 = vpop.permute.xlu0 %764 }
  0xdc   : > { %1022 = vrot.lane.b32.xlu1 %v757_v59, %s2006_s23 }
  0xdd   : > { %1006 = vrot.lane.b32.xlu0 %v733_v27, %s2006_s23 }
  0xde   : > { %v816_v35 = vpop.permute.xlu1 %815 }
  0xdf   : > { %v800_v6 = vpop.permute.xlu0 %799 }
  0xe0   : > { %707 = vrot.lane.b32.xlu1 %v676_v62, %s2001_s6 }
  0xe1   : > { %691 = vrot.lane.b32.xlu0 %v580_v4, %s2001_s6 }
  0xe2   : > { %v2551_v25 = vpop.permute.xlu1 %817 }
  0xe3   : > { %v2553_v28 = vpop.permute.xlu0 %801 }
  0xe4   : > { %786 = vrot.lane.b32.xlu1 %v2417_v60, %s2000_s5  ;;  %v831_v60 = vshrl.u32 %v1913_v53, 16 }
  0xe5   : > { %770 = vrot.lane.b32.xlu0 %v2429_v7, %s2000_s5 }
  0xe6   : > { %v863_v0 = vpop.permute.xlu1 %862  ;;  %v836_v38 = vor.u32 %v835_v34, %v831_v60  ;;  %v1917_v60 = vld [vmem:[%s2094_s30 + $0x60] sm:$0xff]  }
  0xe7   : > { %v847_v52 = vpop.permute.xlu0 %846 }
  0xe8   : > { %788 = vrot.lane.b32.xlu1 %v757_v59, %s2000_s5  ;;  %v2580_v54 = vsel %vm484_vm1, %v836_v38, %v840_v8 }
  0xe9   : > { %772 = vrot.lane.b32.xlu0 %v733_v27, %s2000_s5 }
  0xea   : > { %v2563_v63 = vpop.permute.xlu1 %864 }
  0xeb   : > { %v2565_v5 = vpop.permute.xlu0 %848 }
  0xec   : > { %823 = vrot.lane.b32.xlu1 %v2420_v3, %s1999_s4 }
  0xed   : > { %807 = vrot.lane.b32.xlu0 %v2432_v45, %s1999_s4 }
  0xee   : > { %v898_v7 = vpop.permute.xlu1 %897 }
  0xef   : > { %v882_v47 = vpop.permute.xlu0 %881 }
  0xf0   : > { %825 = vrot.lane.b32.xlu1 %v1913_v53, %s1999_s4 }
  0xf1   : > { %809 = vrot.lane.b32.xlu0 %v2107_v2, %s1999_s4  ;;  %v875_v2 = vrot.slane %v1914_v18, 1  ;;  %v954_v18 = vrot.slane %v952_v30, 1  ;;  %v994_v30 = vrot.slane %v2604_v24, 1  ;;  %s1744_s4 = sshll.u32 %s1989_s15, 12 }
  0xf2   : > { %v2574_v16 = vpop.permute.xlu1 %899 }
  0xf3   : > { %v2576_v17 = vpop.permute.xlu0 %883  ;;  %v955_v8 = vor.u32 %v954_v18, %v950_v46 }
  0xf4   : > { %870 = vrot.lane.b32.xlu1 %v676_v62, %s2002_s7  ;;  %v2591_v62 = vsel %vm709_vm0, %v874_v22, %v875_v2 }
  0xf5   : > { %854 = vrot.lane.b32.xlu0 %v580_v4, %s2002_s7  ;;  %v1050_v4 = vsel %vm1028_vm3, %v2143_v41, %v2489_v1  ;;  %v1067_v1 = vsel %vm1061_vm4, %v1034_v37, %v2535_v39 }
  0xf6   : > { %v935_v20 = vpop.permute.xlu1 %934  ;;  %v1083_v36 = vsel %vm1061_vm4, %v1050_v4, %v779_v32  ;;  %v1100_v33 = vsel %vm1094_vm6, %v1067_v1, %v800_v6 }
  0xf7   : > { %v919_v42 = vpop.permute.xlu0 %918  ;;  %v1116_v11 = vsel %vm1094_vm6, %v1083_v36, %v816_v35  ;;  %v1133_v19 = vsel %vm1127_vm5, %v1100_v33, %v847_v52  ;;  %v1052_v52 = vsel %vm1028_vm3, %v2190_v10, %v2523_v15  ;;  %v1918_v15 = vld [vmem:[%s2094_s30 + $0x6c] sm:$0xff]   ;;  %s2769_s30 = scalar_lea.vmem [#allocation2], %s1678_s27 }
  0xf8   : > { %872 = vrot.lane.b32.xlu1 %v2580_v54, %s2002_s7  ;;  %v1149_v32 = vsel %vm1127_vm5, %v1116_v11, %v863_v0  ;;  %v1166_v39 = vsel %vm1160_vm7, %v1133_v19, %v882_v47  ;;  %v1085_v47 = vsel %vm1061_vm4, %v1052_v52, %v2542_v49  ;;  %s1558_s6 = sshll.u32 %s2769_s30, 4  ;;  %s2838_s6 = int_to_ptr.vmem [resolvable:$true] %s1558_s6 }
  0xf9   : > { %856 = vrot.lane.b32.xlu0 %v2158_v51, %s2002_s7  ;;  %v1118_v10 = vsel %vm1094_vm6, %v1085_v47, %v2551_v25  ;;  %s1919_s18 = scalar_lea.vmem %s2838_s6, 4096 }
  0xfa   : > { %v937_v55 = vpop.permute.xlu1 %936  ;;  %v1151_v2 = vsel %vm1127_vm5, %v1118_v10, %v2563_v63  ;;  %p1920_p12 = scmp.ne.s32.totalorder %s2838_s6, %s1919_s18 }
  0xfb   : > { %v2587_v21 = vpop.permute.xlu0 %920 }
  0xfc   : > { %905 = vrot.lane.b32.xlu1 %v757_v59, %s2003_s8  ;;  %v1182_v59 = vsel %vm1160_vm7, %v1149_v32, %v898_v7  ;;  %p1921_p13 = pnand %p1920_p12, %p2069_p4 }
  0xfd   : > { %889 = vrot.lane.b32.xlu0 %v733_v27, %s2003_s8  ;;  %v1215_v35 = vsel %vm1193_vm8, %v1182_v59, %v935_v20  ;;  %v959_v20 = vrot.slane %v957_v29, 1 }
  0xfe   : > { %v982_v23 = vpop.permute.xlu1 %981  ;;  %p1922_p0 = pneg %p1921_p13 }
  0xff   : > { %v966_v31 = vpop.permute.xlu0 %965  ;;  %v1248_v0 = vsel %vm1226_vm9, %v1215_v35, %v982_v23 }
 0x100   : > { %907 = vrot.lane.b32.xlu1 %v2591_v62, %s2003_s8 }
 0x101   : > { %891 = vrot.lane.b32.xlu0 %v2121_v13, %s2003_s8  ;;  %s2832_s8 = scalar_lea.hbm %s2896_s3, %s1744_s4 }
 0x102   : > { %v984_v41 = vpop.permute.xlu1 %983 }
 0x103   : > { %v968_v27 = vpop.permute.xlu0 %967 }
 0x104   : > { %942 = vrot.lane.b32.xlu1 %v1913_v53, %s2004_s19  ;;  %v1199_v53 = vsel %vm1193_vm8, %v1166_v39, %v919_v42  ;;  %v1036_v42 = vsel %vm1028_vm3, %v2200_v14, %v2525_v61  ;;  %v1184_v14 = vsel %vm1160_vm7, %v1151_v2, %v2574_v16 }
 0x105   : > { %926 = vrot.lane.b32.xlu0 %v1917_v60, %s2004_s19  ;;  %v1232_v50 = vsel %vm1226_vm9, %v1199_v53, %v966_v31  ;;  %v1069_v49 = vsel %vm1061_vm4, %v1036_v42, %v2545_v40  ;;  %v1217_v4 = vsel %vm1193_vm8, %v1184_v14, %v937_v55  ;;  %v960_v40 = vsel %vm484_vm1, %v955_v8, %v959_v20 }
 0x106   : > { %v1017_v6 = vpop.permute.xlu1 %1016  ;;  %v1102_v23 = vsel %vm1094_vm6, %v1069_v49, %v2553_v28  ;;  %v1250_v31 = vsel %vm1226_vm9, %v1217_v4, %v984_v41  ;;  %v993_v55 = vrot.slane %v2594_v57, 1 }
 0x107   : > { %v1281_v34 = vsel %vm1259_vm10, %v1248_v0, %v1017_v6  ;;  %v1001_v7 = vpop.permute.xlu0 %1000  ;;  %v1135_v25 = vsel %vm1127_vm5, %v1102_v23, %v2565_v5 }
 0x108   : > { %944 = vrot.lane.b32.xlu1 %v2594_v57, %s2004_s19  ;;  %1790 = vmatprep.mubr.msk.bf16.mxu1 %vm1312_vm11, %v1281_v34  ;;  %v1265_v38 = vsel %vm1259_vm10, %v1232_v50, %v1001_v7  ;;  %v1168_v63 = vsel %vm1160_vm7, %v1135_v25, %v2576_v17  ;;  %v995_v37 = vsel %vm709_vm0, %v993_v55, %v994_v30 }
 0x109   : > { %928 = vrot.lane.b32.xlu0 %v1918_v15, %s2004_s19  ;;  %1774 = vmatprep.mubr.msk.bf16.mxu0 %vm1312_vm11, %v1265_v38  ;;  %v1201_v16 = vsel %vm1193_vm8, %v1168_v63, %v2587_v21  ;;  %s2007_s19 = smov [#allocation2]  }
 0x10a   : > { %v702_v22 = vpop.permute.xlu1 %701  ;;  %v1234_v5 = vsel %vm1226_vm9, %v1201_v16, %v968_v27 }
 0x10b   : > { %v686_v61 = vpop.permute.xlu0 %685 }
 0x10c   : > { %989 = vrot.lane.b32.xlu1 %v2580_v54, %s2005_s21  ;;  %v1038_v52 = vsel %vm1028_vm3, %v2256_v44, %v686_v61 }
 0x10d   : > { %973 = vrot.lane.b32.xlu0 %v2158_v51, %s2005_s21 }
 0x10e   : > { %v1019_v28 = vpop.permute.xlu1 %1018 }
 0x10f   : > { %v1283_v54 = vsel %vm1259_vm10, %v1250_v31, %v1019_v28  ;;  %v1003_v36 = vpop.permute.xlu0 %1002 }
 0x110   : > { %991 = vrot.lane.b32.xlu1 %v960_v40, %s2005_s21  ;;  %1791 = vmatmul.mubr.msk.bf16.gmra.mrb[4].mxu1 %vm1312_vm11, %v1283_v54  ;;  %v1267_v17 = vsel %vm1259_vm10, %v1234_v5, %v1003_v36 }
 0x111   : > { %975 = vrot.lane.b32.xlu0 %v2152_v48, %s2005_s21  ;;  %1775 = vmatmul.mubr.msk.bf16.gmra.mrb[4].mxu0 %vm1312_vm11, %v1267_v17  ;;  %s1923_s21 = sshll.u32 %s2007_s19, 4  ;;  %s1924_s21 = int_to_ptr.vmem [resolvable:$false] %s1923_s21 }
 0x112   : > { %v704_v51 = vpop.permute.xlu1 %703  ;;  %p1926_p1 = scmp.lt.s32.totalorder %s2838_s6, %s1924_s21 }
 0x113   : > { %v688_v21 = vpop.permute.xlu0 %687  ;;  %v1056_v23 = vsel %vm1028_vm3, %v2292_v9, %v704_v51 }
 0x114   : > { %1024 = vrot.lane.b32.xlu1 %v2591_v62, %s2006_s23  ;;  %v1040_v40 = vsel %vm1028_vm3, %v2297_v12, %v688_v21 }
 0x115   : > { %1008 = vrot.lane.b32.xlu0 %v2121_v13, %s2006_s23 }
 0x116   : > { %v783_v11 = vpop.permute.xlu1 %782 }
 0x117   : > { %v767_v41 = vpop.permute.xlu0 %766 }
 0x118   : > { %1026 = vrot.lane.b32.xlu1 %v995_v37, %s2006_s23  ;;  %v1071_v47 = vsel %vm1061_vm4, %v1038_v52, %v767_v41 }
 0x119   : > { %1010 = vrot.lane.b32.xlu0 %v2133_v26, %s2006_s23  ;;  %v1054_v26 = vsel %vm1028_vm3, %v2251_v43, %v702_v22  ;;  %s1925_s23 = scalar_lea.vmem %s1924_s21, 8192 }
 0x11a   : > { %v785_v48 = vpop.permute.xlu1 %784  ;;  %v1087_v34 = vsel %vm1061_vm4, %v1054_v26, %v783_v11  ;;  %p1927_p2 = scmp.lt.s32.totalorder %s1925_s23, %s1919_s18 }
 0x11b   : > { %v769_v57 = vpop.permute.xlu0 %768  ;;  %v1089_v25 = vsel %vm1061_vm4, %v1056_v23, %v785_v48 }
 0x11c   : > { %v1073_v28 = vsel %vm1061_vm4, %v1040_v40, %v769_v57  ;;  %p1928_p3 = por %p1927_p2, %p1926_p1 }
 0x11e   : > { %v820_v24 = vpop.permute.xlu1 %819  ;;  %p1929_p5 = pnand %p1928_p3, %p1922_p0 }
 0x11f   : > { %v804_v1 = vpop.permute.xlu0 %803  ;;  %v1120_v50 = vsel %vm1094_vm6, %v1087_v34, %v820_v24 }
 0x120   : > { %v1104_v8 = vsel %vm1094_vm6, %v1071_v47, %v804_v1 }
 0x122   : > { %v822_v32 = vpop.permute.xlu1 %821 }
 0x123   : > { %v806_v33 = vpop.permute.xlu0 %805  ;;  %v1122_v63 = vsel %vm1094_vm6, %v1089_v25, %v822_v32 }
 0x124   : > { %v1106_v16 = vsel %vm1094_vm6, %v1073_v28, %v806_v33 }
 0x126   : > { %v867_v59 = vpop.permute.xlu1 %866 }
 0x127   : > { %v851_v62 = vpop.permute.xlu0 %850  ;;  %v1153_v38 = vsel %vm1127_vm5, %v1120_v50, %v867_v59 }
 0x128   : > { %v1137_v43 = vsel %vm1127_vm5, %v1104_v8, %v851_v62 }
 0x12a   : > { %v869_v27 = vpop.permute.xlu1 %868 }
 0x12b   : > { %v853_v46 = vpop.permute.xlu0 %852  ;;  %v1155_v9 = vsel %vm1127_vm5, %v1122_v63, %v869_v27 }
 0x12c   : > { %v1139_v36 = vsel %vm1127_vm5, %v1106_v16, %v853_v46 }
 0x12e   : > { %v902_v19 = vpop.permute.xlu1 %901 }
 0x12f   : > { %v886_v35 = vpop.permute.xlu0 %885  ;;  %v1186_v20 = vsel %vm1160_vm7, %v1153_v38, %v902_v19 }
 0x130   : > { %v1170_v15 = vsel %vm1160_vm7, %v1137_v43, %v886_v35 }
 0x132   : > { %v904_v13 = vpop.permute.xlu1 %903 }
 0x133   : > { %v888_v18 = vpop.permute.xlu0 %887  ;;  %v1188_v54 = vsel %vm1160_vm7, %v1155_v9, %v904_v13 }
 0x134   : > { %v1172_v12 = vsel %vm1160_vm7, %v1139_v36, %v888_v18 }
 0x136   : > { %v939_v29 = vpop.permute.xlu1 %938 }
 0x137   : > { %v923_v39 = vpop.permute.xlu0 %922  ;;  %v1219_v10 = vsel %vm1193_vm8, %v1186_v20, %v939_v29 }
 0x138   : > { %v1203_v49 = vsel %vm1193_vm8, %v1170_v15, %v923_v39 }
 0x13a   : > { %v941_v0 = vpop.permute.xlu1 %940 }
 0x13b   : > { %v925_v60 = vpop.permute.xlu0 %924  ;;  %v1221_v17 = vsel %vm1193_vm8, %v1188_v54, %v941_v0 }
 0x13c   : > { %v1205_v51 = vsel %vm1193_vm8, %v1172_v12, %v925_v60 }
 0x13e   : > { %v986_v6 = vpop.permute.xlu1 %985 }
 0x13f   : > { %v970_v53 = vpop.permute.xlu0 %969  ;;  %v1252_v44 = vsel %vm1226_vm9, %v1219_v10, %v986_v6 }
 0x140   : > { %v1236_v14 = vsel %vm1226_vm9, %v1203_v49, %v970_v53 }
 0x142   : > { %v988_v7 = vpop.permute.xlu1 %987 }
 0x143   : > { %v972_v42 = vpop.permute.xlu0 %971  ;;  %v1254_v55 = vsel %vm1226_vm9, %v1221_v17, %v988_v7 }
 0x144   : > { %v1238_v37 = vsel %vm1226_vm9, %v1205_v51, %v972_v42 }
 0x146   : > { %v1021_v22 = vpop.permute.xlu1 %1020 }
 0x147   : > { %v1285_v2 = vsel %vm1259_vm10, %v1252_v44, %v1021_v22  ;;  %v1005_v61 = vpop.permute.xlu0 %1004 }
 0x148   : > { %1794 = vmatprep.mubr.msk.bf16.mxu1 %vm1312_vm11, %v1285_v2  ;;  %v1269_v4 = vsel %vm1259_vm10, %v1236_v14, %v1005_v61 }
 0x149   : > { %1778 = vmatprep.mubr.msk.bf16.mxu0 %vm1312_vm11, %v1269_v4 }
 0x14a   : > { %v706_v31 = vpop.permute.xlu1 %705 }
 0x14b   : > { %v690_v5 = vpop.permute.xlu0 %689  ;;  %v1058_v50 = vsel %vm1028_vm3, %v2358_v56, %v706_v31 }
 0x14c   : > { %v1042_v38 = vsel %vm1028_vm3, %v2364_v58, %v690_v5 }
 0x14e   : > { %v1023_v30 = vpop.permute.xlu1 %1022 }
 0x14f   : > { %v1287_v21 = vsel %vm1259_vm10, %v1254_v55, %v1023_v30  ;;  %v1007_v11 = vpop.permute.xlu0 %1006 }
 0x150   : > { %1795 = vmatmul.mubr.msk.bf16.gmra.mrb[8].mxu1 %vm1312_vm11, %v1287_v21  ;;  %v1271_v41 = vsel %vm1259_vm10, %v1238_v37, %v1007_v11 }
 0x151   : > { %1779 = vmatmul.mubr.msk.bf16.gmra.mrb[8].mxu0 %vm1312_vm11, %v1271_v41 }
 0x152   : > { %v708_v48 = vpop.permute.xlu1 %707 }
 0x153   : > { %v692_v57 = vpop.permute.xlu0 %691  ;;  %v1060_v10 = vsel %vm1028_vm3, %v2420_v3, %v708_v48 }
 0x154   : > { %v1044_v2 = vsel %vm1028_vm3, %v2432_v45, %v692_v57 }
 0x156   : > { %v787_v24 = vpop.permute.xlu1 %786 }
 0x157   : > { %v771_v1 = vpop.permute.xlu0 %770  ;;  %v1091_v47 = vsel %vm1061_vm4, %v1058_v50, %v787_v24 }
 0x158   : > { %v1075_v42 = vsel %vm1061_vm4, %v1042_v38, %v771_v1 }
 0x15a   : > { %v789_v32 = vpop.permute.xlu1 %788 }
 0x15b   : > { %v773_v33 = vpop.permute.xlu0 %772  ;;  %v1093_v22 = vsel %vm1061_vm4, %v1060_v10, %v789_v32 }
 0x15c   : > { %v1077_v25 = vsel %vm1061_vm4, %v1044_v2, %v773_v33 }
 0x15e   : > { %v824_v59 = vpop.permute.xlu1 %823 }
 0x15f   : > { %v808_v62 = vpop.permute.xlu0 %807  ;;  %v1124_v8 = vsel %vm1094_vm6, %v1091_v47, %v824_v59 }
 0x160   : > { %v1108_v15 = vsel %vm1094_vm6, %v1075_v42, %v808_v62 }
 0x162   : > { %v826_v27 = vpop.permute.xlu1 %825 }
 0x163   : > { %v810_v46 = vpop.permute.xlu0 %809  ;;  %v1126_v23 = vsel %vm1094_vm6, %v1093_v22, %v826_v27 }
 0x164   : > { %v1110_v31 = vsel %vm1094_vm6, %v1077_v25, %v810_v46 }
 0x166   : > { %v871_v19 = vpop.permute.xlu1 %870 }
 0x167   : > { %v855_v35 = vpop.permute.xlu0 %854  ;;  %v1157_v43 = vsel %vm1127_vm5, %v1124_v8, %v871_v19 }
 0x168   : > { %v1141_v49 = vsel %vm1127_vm5, %v1108_v15, %v855_v35 }
 0x16a   : > { %v873_v13 = vpop.permute.xlu1 %872 }
 0x16b   : > { %v857_v18 = vpop.permute.xlu0 %856  ;;  %v1159_v4 = vsel %vm1127_vm5, %v1126_v23, %v873_v13 }
 0x16c   : > { %v1143_v16 = vsel %vm1127_vm5, %v1110_v31, %v857_v18 }
 0x16e   : > { %v906_v29 = vpop.permute.xlu1 %905 }
 0x16f   : > { %v890_v39 = vpop.permute.xlu0 %889  ;;  %v1190_v56 = vsel %vm1160_vm7, %v1157_v43, %v906_v29 }
 0x170   : > { %v1174_v14 = vsel %vm1160_vm7, %v1141_v49, %v890_v39 }
 0x172   : > { %v908_v0 = vpop.permute.xlu1 %907 }
 0x173   : > { %v892_v60 = vpop.permute.xlu0 %891  ;;  %v1192_v28 = vsel %vm1160_vm7, %v1159_v4, %v908_v0 }
 0x174   : > { %v1176_v36 = vsel %vm1160_vm7, %v1143_v16, %v892_v60 }
 0x176   : > { %v943_v6 = vpop.permute.xlu1 %942 }
 0x177   : > { %v927_v26 = vpop.permute.xlu0 %926  ;;  %v1223_v58 = vsel %vm1193_vm8, %v1190_v56, %v943_v6 }
 0x178   : > { %v1207_v40 = vsel %vm1193_vm8, %v1174_v14, %v927_v26 }
 0x17a   : > { %v945_v53 = vpop.permute.xlu1 %944 }
 0x17b   : > { %v929_v34 = vpop.permute.xlu0 %928  ;;  %v1225_v54 = vsel %vm1193_vm8, %v1192_v28, %v945_v53 }
 0x17c   : > { %v1209_v55 = vsel %vm1193_vm8, %v1176_v36, %v929_v34 }
 0x17e   : > { %v990_v52 = vpop.permute.xlu1 %989 }
 0x17f   : > { %v974_v7 = vpop.permute.xlu0 %973  ;;  %v1256_v3 = vsel %vm1226_vm9, %v1223_v58, %v990_v52 }
 0x180   : > { %v1240_v45 = vsel %vm1226_vm9, %v1207_v40, %v974_v7 }
 0x182   : > { %v992_v20 = vpop.permute.xlu1 %991 }
 0x183   : > { %v976_v44 = vpop.permute.xlu0 %975  ;;  %v1258_v17 = vsel %vm1226_vm9, %v1225_v54, %v992_v20 }
 0x184   : > { %v1242_v51 = vsel %vm1226_vm9, %v1209_v55, %v976_v44 }
 0x186   : > { %v1025_v61 = vpop.permute.xlu1 %1024 }
 0x187   : > { %v1289_v63 = vsel %vm1259_vm10, %v1256_v3, %v1025_v61  ;;  %v1009_v9 = vpop.permute.xlu0 %1008 }
 0x188   : > { %1798 = vmatprep.mubr.msk.bf16.mxu1 %vm1312_vm11, %v1289_v63  ;;  %v1273_v5 = vsel %vm1259_vm10, %v1240_v45, %v1009_v9 }
 0x189   : > { %1782 = vmatprep.mubr.msk.bf16.mxu0 %vm1312_vm11, %v1273_v5 }
 0x18a   : > { %v1027_v12 = vpop.permute.xlu1 %1026 }
 0x18b   : > { %v1291_v30 = vsel %vm1259_vm10, %v1258_v17, %v1027_v12  ;;  %v1011_v21 = vpop.permute.xlu0 %1010 }
 0x18c   : > { %1799 = vmatmul.mubr.msk.bf16.gmra.mrb[12].mxu1 %vm1312_vm11, %v1291_v30  ;;  %v1275_v37 = vsel %vm1259_vm10, %v1242_v51, %v1011_v21 }
 0x18d   : > { %1783 = vmatmul.mubr.msk.bf16.gmra.mrb[12].mxu0 %vm1312_vm11, %v1275_v37 }
 0x1a3   : > { %v1788_v11 = vpop.f32.mrb[0].mxu1 }
 0x1a4   : > { %1528 = vst.msk [vmem:[%s2769_s30 + $0x90] sm:$0xff] %vm1193_vm8, %v1788_v11  ;;  %v1447_v41 = vpop.f32.mrb[1].mxu1  ;;  %v1772_v48 = vpop.f32.mrb[0].mxu0 }
 0x1a5   : > { %1526 = vst.msk [vmem:[%s2769_s30 + $0x80] sm:$0xff] %vm1193_vm8, %v1447_v41  ;;  %v1789_v57 = vpop.f32.mrb[2].mxu1  ;;  %1512 = vst.msk [vmem:[%s2769_s30 + $0x10] sm:$0xff] %vm1193_vm8, %v1772_v48  ;;  %v1383_v24 = vpop.f32.mrb[1].mxu0 }
 0x1a6   : > { %1529 = vst.msk [vmem:[%s2769_s30 + $0x98] sm:$0xff] %vm1193_vm8, %v1789_v57  ;;  %v1450_v1 = vpop.f32.mrb[3].mxu1  ;;  %1510 = vst.msk [vmem:[%s2769_s30] sm:$0xff] %vm1193_vm8, %v1383_v24  ;;  %v1773_v32 = vpop.f32.mrb[2].mxu0 }
 0x1a7   : > { %1527 = vst.msk [vmem:[%s2769_s30 + $0x88] sm:$0xff] %vm1193_vm8, %v1450_v1  ;;  %1513 = vst.msk [vmem:[%s2769_s30 + $0x18] sm:$0xff] %vm1193_vm8, %v1773_v32  ;;  %v1386_v33 = vpop.f32.mrb[3].mxu0 }
 0x1a8   : > { %1511 = vst.msk [vmem:[%s2769_s30 + $0x8] sm:$0xff] %vm1193_vm8, %v1386_v33 }
 0x1e3   : > { %v1792_v59 = vpop.f32.mrb[4].mxu1 }
 0x1e4   : > { %1532 = vst.msk [vmem:[%s2769_s30 + $0xb0] sm:$0xff] %vm1193_vm8, %v1792_v59  ;;  %v1463_v62 = vpop.f32.mrb[5].mxu1  ;;  %v1776_v27 = vpop.f32.mrb[4].mxu0 }
 0x1e5   : > { %1530 = vst.msk [vmem:[%s2769_s30 + $0xa0] sm:$0xff] %vm1193_vm8, %v1463_v62  ;;  %v1793_v46 = vpop.f32.mrb[6].mxu1  ;;  %1516 = vst.msk [vmem:[%s2769_s30 + $0x30] sm:$0xff] %vm1193_vm8, %v1776_v27  ;;  %v1399_v19 = vpop.f32.mrb[5].mxu0 }
 0x1e6   : > { %1533 = vst.msk [vmem:[%s2769_s30 + $0xb8] sm:$0xff] %vm1193_vm8, %v1793_v46  ;;  %v1466_v35 = vpop.f32.mrb[7].mxu1  ;;  %1514 = vst.msk [vmem:[%s2769_s30 + $0x20] sm:$0xff] %vm1193_vm8, %v1399_v19  ;;  %v1777_v13 = vpop.f32.mrb[6].mxu0 }
 0x1e7   : > { %1531 = vst.msk [vmem:[%s2769_s30 + $0xa8] sm:$0xff] %vm1193_vm8, %v1466_v35  ;;  %1517 = vst.msk [vmem:[%s2769_s30 + $0x38] sm:$0xff] %vm1193_vm8, %v1777_v13  ;;  %v1402_v18 = vpop.f32.mrb[7].mxu0 }
 0x1e8   : > { %1515 = vst.msk [vmem:[%s2769_s30 + $0x28] sm:$0xff] %vm1193_vm8, %v1402_v18 }
 0x223   : > { %v1796_v29 = vpop.f32.mrb[8].mxu1 }
 0x224   : > { %1536 = vst.msk [vmem:[%s2769_s30 + $0xd0] sm:$0xff] %vm1193_vm8, %v1796_v29  ;;  %v1479_v39 = vpop.f32.mrb[9].mxu1  ;;  %v1780_v0 = vpop.f32.mrb[8].mxu0 }
 0x225   : > { %1534 = vst.msk [vmem:[%s2769_s30 + $0xc0] sm:$0xff] %vm1193_vm8, %v1479_v39  ;;  %v1797_v60 = vpop.f32.mrb[10].mxu1  ;;  %1520 = vst.msk [vmem:[%s2769_s30 + $0x50] sm:$0xff] %vm1193_vm8, %v1780_v0  ;;  %v1415_v6 = vpop.f32.mrb[9].mxu0 }
 0x226   : > { %1537 = vst.msk [vmem:[%s2769_s30 + $0xd8] sm:$0xff] %vm1193_vm8, %v1797_v60  ;;  %v1482_v26 = vpop.f32.mrb[11].mxu1  ;;  %1518 = vst.msk [vmem:[%s2769_s30 + $0x40] sm:$0xff] %vm1193_vm8, %v1415_v6  ;;  %v1781_v53 = vpop.f32.mrb[10].mxu0 }
 0x227   : > { %1535 = vst.msk [vmem:[%s2769_s30 + $0xc8] sm:$0xff] %vm1193_vm8, %v1482_v26  ;;  %1521 = vst.msk [vmem:[%s2769_s30 + $0x58] sm:$0xff] %vm1193_vm8, %v1781_v53  ;;  %v1418_v34 = vpop.f32.mrb[11].mxu0 }
 0x228   : > { %1519 = vst.msk [vmem:[%s2769_s30 + $0x48] sm:$0xff] %vm1193_vm8, %v1418_v34 }
 0x25f   : > { %v1800_v52 = vpop.f32.mrb[12].mxu1 }
 0x260   : > { %1540 = vst.msk [vmem:[%s2769_s30 + $0xf0] sm:$0xff] %vm1193_vm8, %v1800_v52  ;;  %v1495_v50 = vpop.f32.mrb[13].mxu1  ;;  %v1784_v7 = vpop.f32.mrb[12].mxu0 }
 0x261   : > { %1538 = vst.msk [vmem:[%s2769_s30 + $0xe0] sm:$0xff] %vm1193_vm8, %v1495_v50  ;;  %v1801_v47 = vpop.f32.mrb[14].mxu1  ;;  %1524 = vst.msk [vmem:[%s2769_s30 + $0x70] sm:$0xff] %vm1193_vm8, %v1784_v7  ;;  %v1431_v38 = vpop.f32.mrb[13].mxu0 }
 0x262   : > { %1541 = vst.msk [vmem:[%s2769_s30 + $0xf8] sm:$0xff] %vm1193_vm8, %v1801_v47  ;;  %v1498_v8 = vpop.f32.mrb[15].mxu1  ;;  %1522 = vst.msk [vmem:[%s2769_s30 + $0x60] sm:$0xff] %vm1193_vm8, %v1431_v38  ;;  %v1785_v20 = vpop.f32.mrb[14].mxu0 }
 0x263   : > { %1539 = vst.msk [vmem:[%s2769_s30 + $0xe8] sm:$0xff] %vm1193_vm8, %v1498_v8  ;;  %1525 = vst.msk [vmem:[%s2769_s30 + $0x78] sm:$0xff] %vm1193_vm8, %v1785_v20  ;;  %v1434_v42 = vpop.f32.mrb[15].mxu0 }
 0x264   : > { %1523 = vst.msk [vmem:[%s2769_s30 + $0x68] sm:$0xff] %vm1193_vm8, %v1434_v42 }
 0x265   : > { %1932 = shalt.err (!%p1929_p5)
}
 0x266   : > { %s1933_s28 = scalar_lea.hbm %s2832_s8, 4096  ;;  %s1937_s10 = scalar_lea.hbm %s2896_s3, 8192 }
 0x267   : > { %p1934_p6 = scmp.ne.s32.totalorder %s2832_s8, %s1933_s28  ;;  %p1938_p10 = scmp.lt.u32.totalorder %s2832_s8, %s2896_s3 }
 0x268   : > { %p1939_p11 = scmp.lt.u32.totalorder %s1937_s10, %s1933_s28  ;;  %p1941_p13 = scmp.lt.u32.totalorder %s1933_s28, %s2832_s8 }
 0x269   : > { %p1935_p7 = pnand %p1934_p6, %p2069_p4 }
 0x26a   : > { %p1940_p12 = por %p1939_p11, %p1938_p10 }
 0x26b   : > { %p1936_p9 = pneg %p1935_p7 }
 0x26c   : > { %p1942_p0 = por %p1941_p13, %p1940_p12 }
 0x26e   : > { %p1943_p1 = pnand %p1942_p0, %p1936_p9 }
 0x270   : > { %1946 = shalt.err (!%p1943_p1)
}
 0x271   : > { %s2008_s30 = smov 128  }
 0x272   : > { %1813 = dma.vmem_to_hbm [thread:$0]  (%p2069_p4), %s2838_s6, 4096, %s2832_s8, %s2846_s11, %s2008_s30, %s2008_s30, %s2000_s5  }
 0x273 PF: > { %p1820_p2 = scmp.ge.s32.totalorder %s1997_s17, 2  ;;  %s1573_s4 = sand.u32 1, %s1977_s12  }
 0x274   : > { %s1574_s7 = scalar_lea.sflag [#allocation3], %s1573_s4 }
 0x275   : > { %p1816_p3 = pnand %p1820_p2, %p2076_p8 }
 0x277   : > { %1972 = dma.done.wait (!%p1816_p3), %s1574_s7, 4096  }
 0x278   : > { %1974 = vsyncadd (!%p1816_p3), %s1574_s7, 4294963200  ;;  %s16_s17 = sadd.s32 1, %s1997_s17   ;;  %s2899_s12 = smov %s1981_s13 }
 0x279   : > { %p13_p5 = scmp.ge.s32.totalorder %s16_s17, 4   ;;  %s2900_s13 = smov %s1985_s14 }
 0x27a   : > { %s2901_s14 = smov %s2082_s25  ;;  %s2902_s15 = smov %s1993_s16 }
 0x27b   : > { %s2903_s16 = smov %s2905_s20  ;;  %15 = sbr.rel (!%p13_p5) target bundleno = 4 (0x4), region = 73 }
 0x282   :  { %1579 = vsyncpa [#allocation3], 1 }
 0x283   :  { %1581 = vsyncpa [#allocation3 + $0x1], 1 }

</bundles_post_ra>
